<compile_context>
chip_gen: v6e
topology: v6e:2x2x1
jax: 0.10.0
libtpu: 0.0.40
codegen_flags: <defaults>
</compile_context>

<pallas_src>
import functools

import numpy as np
import jax
import jax.numpy as jnp
from jax import lax
from jax.experimental import pallas as pl
from jax.experimental.pallas import tpu as pltpu

_EPS = 1e-5
_HID = 30            # LSTM hidden size
_HPAD = 32           # lane-padded per-gate width (padding provably stays 0)
_RNN_IN = 32         # fc1 output / LSTM input size
_S = 9               # canonical spatial side (conv1 output)
_R = _S * _S         # 81 rows per sample, kept for the whole conv stack


# --------------------------------------------------------------------------
# The single fused Pallas kernel (one grid step per batch element)
# --------------------------------------------------------------------------

def _fused_forward_kernel(p1_ref, hc_ref, w128_ref, w512_ref, sh_ref, out_ref):
    f32, bf16 = jnp.float32, jnp.bfloat16
    c4 = p1_ref.shape[2]                       # 4 * obs_channels (im2col width)

    # ---- static views into the packed constant blobs ----------------------
    w1  = w128_ref[0:c4, 0:16]                 # conv1 (BN folded)        (4C,16)
    w2  = w128_ref[c4:c4 + 16, :]              # conv2 taps lane-packed   (16,128)
    w3  = w128_ref[c4 + 16:c4 + 48, :]         # conv3                    (32,128)
    wz  = w128_ref[c4 + 48:c4 + 112, :]        # LSTM [W_ih; W_hh] padded (64,128)
    wpv = w128_ref[c4 + 112:c4 + 144, :]       # [fcp | fcv] lane-padded  (32,128)
    w4  = w512_ref[0:32, :]                    # conv4 taps lane-packed   (32,512)
    w5  = w512_ref[32:64, :]                   # fc1 as 4x4 "conv" taps   (32,512)

    sh1 = sh_ref[0:1, 0:16]
    sh2 = sh_ref[1:2, 0:32]
    sh3 = sh_ref[2:3, 0:32]
    sh4 = sh_ref[3:4, 0:32]
    b5  = sh_ref[4:5, 0:32]
    bz  = sh_ref[5:6, :]
    bpv = sh_ref[6:7, :]

    def shift_rows_up(g, d):
        # result[r] = g[r + d]; bottom d rows zero-filled (only ever read by
        # rows outside the valid region, which are never consumed downstream).
        if d == 0:
            return g
        return jnp.concatenate(
            [g[d:, :], jnp.zeros((d, g.shape[1]), g.dtype)], axis=0)

    def conv_block(x, wcat, k, c_out, shift):
        # One lane-packed matmul (N = k*k*c_out) then tap combine by static
        # row-shifted slices: pure data movement, no selection matrices.
        g = jnp.dot(x.astype(bf16), wcat, preferred_element_type=f32)
        acc = None
        for kh in range(k):
            for kw in range(k):
                t = kh * k + kw
                part = shift_rows_up(g[:, t * c_out:(t + 1) * c_out],
                                     kh * _S + kw)
                acc = part if acc is None else acc + part
        return jnp.maximum(acc + shift, 0.0)

    # conv1 + folded BN + ReLU (patches already im2col'd in the wrapper)
    p1 = p1_ref[0]                                                  # (81, 4C) bf16
    x = jnp.maximum(jnp.dot(p1, w1, preferred_element_type=f32) + sh1, 0.0)
    x = conv_block(x, w2, 2, 32, sh2)        # (81,32)  valid 8x8
    x = conv_block(x, w3, 2, 32, sh3)        # (81,32)  valid 7x7
    x = conv_block(x, w4, 4, 32, sh4)        # (81,32)  valid 4x4

    # fc1 as a 4x4 -> 1x1 "conv"; only output row 0 is needed so the taps are
    # gathered as 16 single-row slices of the lane-packed product.
    g5 = jnp.dot(x.astype(bf16), w5, preferred_element_type=f32)    # (81,512)
    r = b5
    for t in range(16):
        d = (t // 4) * _S + (t % 4)
        r = r + g5[d:d + 1, t * _RNN_IN:(t + 1) * _RNN_IN]          # (1,32)

    # LSTM cell: single fused matmul [r | h0] @ [W_ih; W_hh]; gate lanes padded
    # 30 -> 32 with zero weights/bias so the padded state lanes stay exactly 0.
    hc = hc_ref[0]                                                  # (1,64) f32
    h0 = hc[:, 0:_HPAD]
    c0 = hc[:, _HPAD:2 * _HPAD]
    z = jnp.concatenate([r, h0], axis=1)                            # (1,64)
    gates = jnp.dot(z.astype(bf16), wz, preferred_element_type=f32) + bz
    gi = jax.nn.sigmoid(gates[:, 0:_HPAD])
    gf = jax.nn.sigmoid(gates[:, _HPAD:2 * _HPAD])
    gg = jnp.tanh(gates[:, 2 * _HPAD:3 * _HPAD])
    go = jax.nn.sigmoid(gates[:, 3 * _HPAD:4 * _HPAD])
    c1 = gf * c0 + gi * gg
    h1 = go * jnp.tanh(c1)

    # fused policy + value head, then one lane-dense (1,256) store.
    pv = jnp.dot(h1.astype(bf16), wpv, preferred_element_type=f32) + bpv
    out_ref[0] = jnp.concatenate(
        [pv, h1, c1, jnp.zeros((1, 256 - 128 - 2 * _HPAD), f32)], axis=1)


# --------------------------------------------------------------------------
# Host-side parameter creation / folding / packing (batch-independent)
# --------------------------------------------------------------------------

def init_torch_params(obs_channels, action_dim, key):
    """Synthetic parameters in PyTorch layouts (conv OIHW, linear (out,in))."""
    ks = iter(jax.random.split(key, 64))        # BUGFIX: needs 34 keys, was 32

    def rn(shape, s=0.1):
        return s * jax.random.normal(next(ks), shape, jnp.float32)

    def bn(c):
        return dict(gamma=1.0 + rn((c,)), beta=rn((c,)),
                    rmean=rn((c,)), rvar=1.0 + jnp.abs(rn((c,))))

    p = {}
    p['conv1_w'] = rn((16, obs_channels, 2, 2)); p['conv1_b'] = rn((16,)); p['bn1'] = bn(16)
    p['conv2_w'] = rn((32, 16, 2, 2)); p['conv2_b'] = rn((32,)); p['bn2'] = bn(32)
    p['conv3_w'] = rn((32, 32, 2, 2)); p['conv3_b'] = rn((32,)); p['bn3'] = bn(32)
    p['conv4_w'] = rn((32, 32, 4, 4)); p['conv4_b'] = rn((32,)); p['bn4'] = bn(32)
    p['fc1_w'] = rn((_RNN_IN, 512)); p['fc1_b'] = rn((_RNN_IN,))
    p['lstm_w_ih'] = rn((4 * _HID, _RNN_IN)); p['lstm_w_hh'] = rn((4 * _HID, _HID))
    p['lstm_b_ih'] = rn((4 * _HID,)); p['lstm_b_hh'] = rn((4 * _HID,))
    p['fcp_w'] = rn((action_dim, _HID)); p['fcp_b'] = rn((action_dim,))
    p['fcv_w'] = rn((1, _HID)); p['fcv_b'] = rn((1,))
    return p


def pack_params(p, action_dim):
    """Fold eval-BN into conv weights and pack everything into 3 lane-aligned
    constant blobs (bf16 matmul operands, f32 shift/bias rows)."""
    f32, bf16 = jnp.float32, jnp.bfloat16

    def bn_fold(bn, bias):
        scale = bn['gamma'] / jnp.sqrt(bn['rvar'] + _EPS)
        shift = (bias - bn['rmean']) * scale + bn['beta']
        return scale, shift

    def conv_cat(w_pt, scale):
        # torch OIHW -> (C_in, k*k*C_out); lane index = (kh*k + kw)*C_out + co.
        co, ci, k, _ = w_pt.shape
        w = jnp.transpose(w_pt, (1, 2, 3, 0)) * scale[None, None, None, :]
        return w.reshape(ci, k * k * co)

    sc1, sh1 = bn_fold(p['bn1'], p['conv1_b'])
    w1 = jnp.transpose(p['conv1_w'], (2, 3, 1, 0)).reshape(-1, 16) * sc1[None, :]
    sc2, sh2 = bn_fold(p['bn2'], p['conv2_b']); w2 = conv_cat(p['conv2_w'], sc2)
    sc3, sh3 = bn_fold(p['bn3'], p['conv3_b']); w3 = conv_cat(p['conv3_w'], sc3)
    sc4, sh4 = bn_fold(p['bn4'], p['conv4_b']); w4 = conv_cat(p['conv4_w'], sc4)

    # fc1 as a 4x4 -> 1x1 "conv":  w5[c, t*32 + o] = fc1_w[o, c*16 + t]
    w5 = jnp.transpose(p['fc1_w'].reshape(_RNN_IN, 32, 16),
                       (1, 2, 0)).reshape(32, 16 * _RNN_IN)

    def gate_pad_cols(w):        # (rows, 4*30) -> (rows, 128), per-gate padded
        out = jnp.zeros((w.shape[0], 4 * _HPAD), f32)
        for g in range(4):
            out = out.at[:, g * _HPAD:g * _HPAD + _HID].set(
                w[:, g * _HID:(g + 1) * _HID])
        return out

    wz = jnp.concatenate([gate_pad_cols(p['lstm_w_ih'].T),           # (32,128)
                          gate_pad_cols(p['lstm_w_hh'].T),           # (30,128)
                          jnp.zeros((_HPAD - _HID, 4 * _HPAD), f32)], axis=0)
    bz = gate_pad_cols((p['lstm_b_ih'] + p['lstm_b_hh']).reshape(1, -1))

    wpv = jnp.concatenate([p['fcp_w'].T, p['fcv_w'].T], axis=1)      # (30,A+1)
    wpv = jnp.pad(wpv, ((0, _HPAD - _HID), (0, 128 - (action_dim + 1))))
    bpv = jnp.pad(jnp.concatenate([p['fcp_b'], p['fcv_b']]).reshape(1, -1),
                  ((0, 0), (0, 128 - (action_dim + 1))))

    def lane_pad(w, n=128):
        return jnp.pad(w, ((0, 0), (0, n - w.shape[1])))

    w128 = jnp.concatenate([lane_pad(w1), w2, w3, wz, wpv], axis=0)
    pad_r = (-w128.shape[0]) % 8
    if pad_r:
        w128 = jnp.pad(w128, ((0, pad_r), (0, 0)))
    w512 = jnp.concatenate([w4, w5], axis=0)                          # (64,512)

    shifts = jnp.zeros((8, 128), f32)
    shifts = shifts.at[0, 0:16].set(sh1)
    shifts = shifts.at[1, 0:32].set(sh2)
    shifts = shifts.at[2, 0:32].set(sh3)
    shifts = shifts.at[3, 0:32].set(sh4)
    shifts = shifts.at[4, 0:32].set(p['fc1_b'])
    shifts = shifts.at[5, :].set(bz[0])
    shifts = shifts.at[6, :].set(bpv[0])

    return {'w128': w128.astype(bf16), 'w512': w512.astype(bf16), 'shifts': shifts}


# --------------------------------------------------------------------------
# JAX wrapper: input im2col + one pallas_call (batch = parallel grid axis)
# --------------------------------------------------------------------------

def _im2col_batched(x_nhwc, k):
    B, H, W, C = x_nhwc.shape
    Ho, Wo = H - k + 1, W - k + 1
    cols = [x_nhwc[:, kh:kh + Ho, kw:kw + Wo, :]
            for kh in range(k) for kw in range(k)]
    patches = jnp.stack(cols, axis=3)                   # (B, Ho, Wo, k*k, C)
    return patches.reshape(B, Ho * Wo, k * k * C)


@functools.partial(jax.jit, static_argnames=("action_dim",))
def forward(obs_nchw, kp, h0, c0, *, action_dim):
    """obs_nchw (B,C,10,10) -> (p (B,A), v (B,1), h1 (B,30), c1 (B,30))."""
    B = obs_nchw.shape[0]
    x = jnp.transpose(obs_nchw, (0, 2, 3, 1)).astype(jnp.float32)    # NHWC
    p1 = _im2col_batched(x, 2).astype(jnp.bfloat16)                  # (B,81,4C)
    assert p1.shape[1] == _R, "obs spatial must be 10x10 (fc1 expects 512)"
    c4 = p1.shape[2]

    h0p = jnp.pad(h0.astype(jnp.float32), ((0, 0), (0, _HPAD - _HID)))
    c0p = jnp.pad(c0.astype(jnp.float32), ((0, 0), (0, _HPAD - _HID)))
    hc0 = jnp.concatenate([h0p, c0p], axis=1)[:, None, :]            # (B,1,64)

    out = pl.pallas_call(
        _fused_forward_kernel,
        out_shape=jax.ShapeDtypeStruct((B, 1, 256), jnp.float32),
        grid=(B,),
        in_specs=[
            pl.BlockSpec((1, _R, c4), lambda b: (b, 0, 0)),
            pl.BlockSpec((1, 1, 2 * _HPAD), lambda b: (b, 0, 0)),
            pl.BlockSpec(kp['w128'].shape, lambda b: (0, 0)),
            pl.BlockSpec(kp['w512'].shape, lambda b: (0, 0)),
            pl.BlockSpec(kp['shifts'].shape, lambda b: (0, 0)),
        ],
        out_specs=pl.BlockSpec((1, 1, 256), lambda b: (b, 0, 0)),
        compiler_params=pltpu.CompilerParams(
            dimension_semantics=("parallel",)),
    )(p1, hc0, kp['w128'], kp['w512'], kp['shifts'])

    out = out[:, 0, :]
    p_logits = out[:, :action_dim]
    v = out[:, action_dim:action_dim + 1]
    h1 = out[:, 128:128 + _HID]
    c1 = out[:, 160:160 + _HID]
    return p_logits, v, h1, c1


# --------------------------------------------------------------------------
# Pure-JAX f32 reference of the same module (for validation)
# --------------------------------------------------------------------------

def _reference_forward(obs, p, h0, c0):
    hp = lax.Precision.HIGHEST

    def conv_bn_relu(x, w, b, bn):
        y = lax.conv_general_dilated(
            x, w, window_strides=(1, 1), padding='VALID',
            dimension_numbers=('NCHW', 'OIHW', 'NCHW'), precision=hp)
        y = y + b.reshape(1, -1, 1, 1)
        y = ((y - bn['rmean'].reshape(1, -1, 1, 1))
             / jnp.sqrt(bn['rvar'].reshape(1, -1, 1, 1) + _EPS)
             * bn['gamma'].reshape(1, -1, 1, 1)
             + bn['beta'].reshape(1, -1, 1, 1))
        return jnp.maximum(y, 0.0)

    x = obs.astype(jnp.float32)
    x = conv_bn_relu(x, p['conv1_w'], p['conv1_b'], p['bn1'])
    x = conv_bn_relu(x, p['conv2_w'], p['conv2_b'], p['bn2'])
    x = conv_bn_relu(x, p['conv3_w'], p['conv3_b'], p['bn3'])
    x = conv_bn_relu(x, p['conv4_w'], p['conv4_b'], p['bn4'])
    feat = x.reshape(x.shape[0], -1)                      # NCHW flatten
    r = jnp.dot(feat, p['fc1_w'].T, precision=hp) + p['fc1_b']
    gates = (jnp.dot(r, p['lstm_w_ih'].T, precision=hp) + p['lstm_b_ih']
             + jnp.dot(h0, p['lstm_w_hh'].T, precision=hp) + p['lstm_b_hh'])
    i, f, g, o = jnp.split(gates, 4, axis=1)
    i, f, g, o = jax.nn.sigmoid(i), jax.nn.sigmoid(f), jnp.tanh(g), jax.nn.sigmoid(o)
    c1 = f * c0 + i * g
    h1 = o * jnp.tanh(c1)
    p_logits = jnp.dot(h1, p['fcp_w'].T, precision=hp) + p['fcp_b']
    v = jnp.dot(h1, p['fcv_w'].T, precision=hp) + p['fcv_b']
    return p_logits, v, h1, c1


# --------------------------------------------------------------------------

if __name__ == "__main__":
    B, C, H, W = 2, 4, 10, 10          # fc1(512 = 32*4*4) pins spatial to 10x10
    action_dim = 5

    key = jax.random.PRNGKey(0)
    k_obs1, k_obs2, k_par = jax.random.split(key, 3)
    obs1 = jax.random.normal(k_obs1, (B, C, H, W), jnp.float32)
    obs2 = jax.random.normal(k_obs2, (B, C, H, W), jnp.float32)

    params = init_torch_params(C, action_dim, k_par)
    kparams = pack_params(params, action_dim)            # batch-independent

    # Module semantics: _hidden is None at first call -> reset_hidden(): zeros.
    h0 = jnp.zeros((B, _HID), jnp.float32)
    c0 = jnp.zeros((B, _HID), jnp.float32)

    # step 1 (fresh hidden), step 2 (update_hidden_state=True -> feed back)
    p1_, v1_, h1, c1 = forward(obs1, kparams, h0, c0, action_dim=action_dim)
    p2_, v2_, h2, c2 = forward(obs2, kparams, h1, c1, action_dim=action_dim)
    jax.block_until_ready((p1_, v1_, h1, c1, p2_, v2_, h2, c2))

    assert p1_.shape == (B, action_dim) and v1_.shape == (B, 1)
    assert h1.shape == (B, _HID) and c1.shape == (B, _HID)
    for t in (p1_, v1_, h1, c1, p2_, v2_, h2, c2):
        assert bool(jnp.all(jnp.isfinite(t)))

    # Validate against the pure-JAX f32 reference (kernel uses bf16 MXU
    # operands with f32 accumulation -> slightly looser tolerance).
    rp1, rv1, rh1, rc1 = _reference_forward(obs1, params, h0, c0)
    rp2, rv2, rh2, rc2 = _reference_forward(obs2, params, rh1, rc1)
    tol = dict(rtol=2e-2, atol=2e-2)
    np.testing.assert_allclose(np.asarray(p1_), np.asarray(rp1), **tol)
    np.testing.assert_allclose(np.asarray(v1_), np.asarray(rv1), **tol)
    np.testing.assert_allclose(np.asarray(h1), np.asarray(rh1), **tol)
    np.testing.assert_allclose(np.asarray(c1), np.asarray(rc1), **tol)
    np.testing.assert_allclose(np.asarray(p2_), np.asarray(rp2), **tol)
    np.testing.assert_allclose(np.asarray(v2_), np.asarray(rv2), **tol)
    np.testing.assert_allclose(np.asarray(h2), np.asarray(rh2), **tol)
    np.testing.assert_allclose(np.asarray(c2), np.asarray(rc2), **tol)

    print("KERNEL_OK")
</pallas_src>

<mosaic_0001>
module attributes {stable_mosaic.version = 11 : i64} {
  func.func @_fused_forward_kernel(%arg0: i32, %arg1: memref<1x81x16xbf16, #tpu.memory_space<vmem>>, %arg2: memref<1x1x64xf32, #tpu.memory_space<vmem>>, %arg3: memref<160x128xbf16, #tpu.memory_space<vmem>>, %arg4: memref<64x512xbf16, #tpu.memory_space<vmem>>, %arg5: memref<8x128xf32, #tpu.memory_space<vmem>>, %arg6: memref<1x1x256xf32, #tpu.memory_space<vmem>>) attributes {dimension_semantics = [#tpu.dimension_semantics<parallel>], iteration_bounds = array<i64: 2>, scalar_prefetch = 0 : i64, scratch_operands = 0 : i64, tpu.core_type = #tpu.core_type<tc>, window_params = [{transform_indices = @transform_0, window_bounds = array<i64: 1, 81, 16>}, {transform_indices = @transform_1, window_bounds = array<i64: 1, 1, 64>}, {pipeline_mode = #tpu.pipeline_mode<synchronous>, transform_indices = @transform_2, window_bounds = array<i64: 160, 128>}, {pipeline_mode = #tpu.pipeline_mode<synchronous>, transform_indices = @transform_3, window_bounds = array<i64: 64, 512>}, {pipeline_mode = #tpu.pipeline_mode<synchronous>, transform_indices = @transform_4, window_bounds = array<i64: 8, 128>}, {transform_indices = @transform_5, window_bounds = array<i64: 1, 1, 256>}]} {
    %c0 = arith.constant 0 : index
    %c0_0 = arith.constant 0 : index
    %0 = vector.load %arg3[%c0, %c0_0] : memref<160x128xbf16, #tpu.memory_space<vmem>>, vector<16x16xbf16>
    %c16 = arith.constant 16 : index
    %c0_1 = arith.constant 0 : index
    %1 = vector.load %arg3[%c16, %c0_1] : memref<160x128xbf16, #tpu.memory_space<vmem>>, vector<16x128xbf16>
    %c32 = arith.constant 32 : index
    %c0_2 = arith.constant 0 : index
    %2 = vector.load %arg3[%c32, %c0_2] : memref<160x128xbf16, #tpu.memory_space<vmem>>, vector<32x128xbf16>
    %c64 = arith.constant 64 : index
    %c0_3 = arith.constant 0 : index
    %3 = vector.load %arg3[%c64, %c0_3] : memref<160x128xbf16, #tpu.memory_space<vmem>>, vector<64x128xbf16>
    %c128 = arith.constant 128 : index
    %c0_4 = arith.constant 0 : index
    %4 = vector.load %arg3[%c128, %c0_4] : memref<160x128xbf16, #tpu.memory_space<vmem>>, vector<32x128xbf16>
    %c0_5 = arith.constant 0 : index
    %c0_6 = arith.constant 0 : index
    %5 = vector.load %arg4[%c0_5, %c0_6] : memref<64x512xbf16, #tpu.memory_space<vmem>>, vector<32x512xbf16>
    %c32_7 = arith.constant 32 : index
    %c0_8 = arith.constant 0 : index
    %6 = vector.load %arg4[%c32_7, %c0_8] : memref<64x512xbf16, #tpu.memory_space<vmem>>, vector<32x512xbf16>
    %c0_9 = arith.constant 0 : index
    %c0_10 = arith.constant 0 : index
    %7 = vector.load %arg5[%c0_9, %c0_10] : memref<8x128xf32, #tpu.memory_space<vmem>>, vector<1x16xf32>
    %c1 = arith.constant 1 : index
    %c0_11 = arith.constant 0 : index
    %8 = vector.load %arg5[%c1, %c0_11] : memref<8x128xf32, #tpu.memory_space<vmem>>, vector<1x32xf32>
    %c2 = arith.constant 2 : index
    %c0_12 = arith.constant 0 : index
    %9 = vector.load %arg5[%c2, %c0_12] : memref<8x128xf32, #tpu.memory_space<vmem>>, vector<1x32xf32>
    %c3 = arith.constant 3 : index
    %c0_13 = arith.constant 0 : index
    %10 = vector.load %arg5[%c3, %c0_13] : memref<8x128xf32, #tpu.memory_space<vmem>>, vector<1x32xf32>
    %c4 = arith.constant 4 : index
    %c0_14 = arith.constant 0 : index
    %11 = vector.load %arg5[%c4, %c0_14] : memref<8x128xf32, #tpu.memory_space<vmem>>, vector<1x32xf32>
    %c5 = arith.constant 5 : index
    %c0_15 = arith.constant 0 : index
    %12 = vector.load %arg5[%c5, %c0_15] : memref<8x128xf32, #tpu.memory_space<vmem>>, vector<1x128xf32>
    %c6 = arith.constant 6 : index
    %c0_16 = arith.constant 0 : index
    %13 = vector.load %arg5[%c6, %c0_16] : memref<8x128xf32, #tpu.memory_space<vmem>>, vector<1x128xf32>
    %c0_17 = arith.constant 0 : index
    %c0_18 = arith.constant 0 : index
    %c0_19 = arith.constant 0 : index
    %14 = vector.load %arg1[%c0_17, %c0_18, %c0_19] : memref<1x81x16xbf16, #tpu.memory_space<vmem>>, vector<1x81x16xbf16>
    %15 = vector.shape_cast %14 : vector<1x81x16xbf16> to vector<81x16xbf16>
    %cst = arith.constant dense<0.000000e+00> : vector<81x16xf32>
    %16 = tpu.matmul %15, %0, %cst {dimension_numbers = #tpu.dot_dimension_numbers<[1], [0], [0], [1], [0, 0, 1, 1], [], []>} : vector<81x16xbf16>, vector<16x16xbf16>, vector<81x16xf32> -> vector<81x16xf32>
    %17 = vector.broadcast %7 : vector<1x16xf32> to vector<81x16xf32>
    %18 = arith.addf %16, %17 : vector<81x16xf32>
    %cst_20 = arith.constant 0.000000e+00 : f32
    %19 = vector.broadcast %cst_20 : f32 to vector<81x16xf32>
    %20 = arith.maximumf %18, %19 : vector<81x16xf32>
    %21 = arith.truncf %20 : vector<81x16xf32> to vector<81x16xbf16>
    %cst_21 = arith.constant dense<0.000000e+00> : vector<81x128xf32>
    %22 = tpu.matmul %21, %1, %cst_21 {dimension_numbers = #tpu.dot_dimension_numbers<[1], [0], [0], [1], [0, 0, 1, 1], [], []>} : vector<81x16xbf16>, vector<16x128xbf16>, vector<81x128xf32> -> vector<81x128xf32>
    %23 = vector.extract_strided_slice %22 {offsets = [0, 0], sizes = [81, 32], strides = [1, 1]} : vector<81x128xf32> to vector<81x32xf32>
    %24 = vector.extract_strided_slice %22 {offsets = [0, 32], sizes = [81, 32], strides = [1, 1]} : vector<81x128xf32> to vector<81x32xf32>
    %25 = vector.extract_strided_slice %24 {offsets = [1, 0], sizes = [80, 32], strides = [1, 1]} : vector<81x32xf32> to vector<80x32xf32>
    %cst_22 = arith.constant 0.000000e+00 : f32
    %26 = vector.broadcast %cst_22 : f32 to vector<1x32xf32>
    %27 = tpu.concatenate %25, %26 in 0 : vector<80x32xf32>, vector<1x32xf32> -> vector<81x32xf32>
    %28 = arith.addf %23, %27 : vector<81x32xf32>
    %29 = vector.extract_strided_slice %22 {offsets = [0, 64], sizes = [81, 32], strides = [1, 1]} : vector<81x128xf32> to vector<81x32xf32>
    %30 = vector.extract_strided_slice %29 {offsets = [9, 0], sizes = [72, 32], strides = [1, 1]} : vector<81x32xf32> to vector<72x32xf32>
    %cst_23 = arith.constant 0.000000e+00 : f32
    %31 = vector.broadcast %cst_23 : f32 to vector<9x32xf32>
    %32 = tpu.concatenate %30, %31 in 0 : vector<72x32xf32>, vector<9x32xf32> -> vector<81x32xf32>
    %33 = arith.addf %28, %32 : vector<81x32xf32>
    %34 = vector.extract_strided_slice %22 {offsets = [0, 96], sizes = [81, 32], strides = [1, 1]} : vector<81x128xf32> to vector<81x32xf32>
    %35 = vector.extract_strided_slice %34 {offsets = [10, 0], sizes = [71, 32], strides = [1, 1]} : vector<81x32xf32> to vector<71x32xf32>
    %cst_24 = arith.constant 0.000000e+00 : f32
    %36 = vector.broadcast %cst_24 : f32 to vector<10x32xf32>
    %37 = tpu.concatenate %35, %36 in 0 : vector<71x32xf32>, vector<10x32xf32> -> vector<81x32xf32>
    %38 = arith.addf %33, %37 : vector<81x32xf32>
    %39 = vector.broadcast %8 : vector<1x32xf32> to vector<81x32xf32>
    %40 = arith.addf %38, %39 : vector<81x32xf32>
    %cst_25 = arith.constant 0.000000e+00 : f32
    %41 = vector.broadcast %cst_25 : f32 to vector<81x32xf32>
    %42 = arith.maximumf %40, %41 : vector<81x32xf32>
    %43 = arith.truncf %42 : vector<81x32xf32> to vector<81x32xbf16>
    %cst_26 = arith.constant dense<0.000000e+00> : vector<81x128xf32>
    %44 = tpu.matmul %43, %2, %cst_26 {dimension_numbers = #tpu.dot_dimension_numbers<[1], [0], [0], [1], [0, 0, 1, 1], [], []>} : vector<81x32xbf16>, vector<32x128xbf16>, vector<81x128xf32> -> vector<81x128xf32>
    %45 = vector.extract_strided_slice %44 {offsets = [0, 0], sizes = [81, 32], strides = [1, 1]} : vector<81x128xf32> to vector<81x32xf32>
    %46 = vector.extract_strided_slice %44 {offsets = [0, 32], sizes = [81, 32], strides = [1, 1]} : vector<81x128xf32> to vector<81x32xf32>
    %47 = vector.extract_strided_slice %46 {offsets = [1, 0], sizes = [80, 32], strides = [1, 1]} : vector<81x32xf32> to vector<80x32xf32>
    %cst_27 = arith.constant 0.000000e+00 : f32
    %48 = vector.broadcast %cst_27 : f32 to vector<1x32xf32>
    %49 = tpu.concatenate %47, %48 in 0 : vector<80x32xf32>, vector<1x32xf32> -> vector<81x32xf32>
    %50 = arith.addf %45, %49 : vector<81x32xf32>
    %51 = vector.extract_strided_slice %44 {offsets = [0, 64], sizes = [81, 32], strides = [1, 1]} : vector<81x128xf32> to vector<81x32xf32>
    %52 = vector.extract_strided_slice %51 {offsets = [9, 0], sizes = [72, 32], strides = [1, 1]} : vector<81x32xf32> to vector<72x32xf32>
    %cst_28 = arith.constant 0.000000e+00 : f32
    %53 = vector.broadcast %cst_28 : f32 to vector<9x32xf32>
    %54 = tpu.concatenate %52, %53 in 0 : vector<72x32xf32>, vector<9x32xf32> -> vector<81x32xf32>
    %55 = arith.addf %50, %54 : vector<81x32xf32>
    %56 = vector.extract_strided_slice %44 {offsets = [0, 96], sizes = [81, 32], strides = [1, 1]} : vector<81x128xf32> to vector<81x32xf32>
    %57 = vector.extract_strided_slice %56 {offsets = [10, 0], sizes = [71, 32], strides = [1, 1]} : vector<81x32xf32> to vector<71x32xf32>
    %cst_29 = arith.constant 0.000000e+00 : f32
    %58 = vector.broadcast %cst_29 : f32 to vector<10x32xf32>
    %59 = tpu.concatenate %57, %58 in 0 : vector<71x32xf32>, vector<10x32xf32> -> vector<81x32xf32>
    %60 = arith.addf %55, %59 : vector<81x32xf32>
    %61 = vector.broadcast %9 : vector<1x32xf32> to vector<81x32xf32>
    %62 = arith.addf %60, %61 : vector<81x32xf32>
    %cst_30 = arith.constant 0.000000e+00 : f32
    %63 = vector.broadcast %cst_30 : f32 to vector<81x32xf32>
    %64 = arith.maximumf %62, %63 : vector<81x32xf32>
    %65 = arith.truncf %64 : vector<81x32xf32> to vector<81x32xbf16>
    %cst_31 = arith.constant dense<0.000000e+00> : vector<81x512xf32>
    %66 = tpu.matmul %65, %5, %cst_31 {dimension_numbers = #tpu.dot_dimension_numbers<[1], [0], [0], [1], [0, 0, 1, 1], [], []>} : vector<81x32xbf16>, vector<32x512xbf16>, vector<81x512xf32> -> vector<81x512xf32>
    %67 = vector.extract_strided_slice %66 {offsets = [0, 0], sizes = [81, 32], strides = [1, 1]} : vector<81x512xf32> to vector<81x32xf32>
    %68 = vector.extract_strided_slice %66 {offsets = [0, 32], sizes = [81, 32], strides = [1, 1]} : vector<81x512xf32> to vector<81x32xf32>
    %69 = vector.extract_strided_slice %68 {offsets = [1, 0], sizes = [80, 32], strides = [1, 1]} : vector<81x32xf32> to vector<80x32xf32>
    %cst_32 = arith.constant 0.000000e+00 : f32
    %70 = vector.broadcast %cst_32 : f32 to vector<1x32xf32>
    %71 = tpu.concatenate %69, %70 in 0 : vector<80x32xf32>, vector<1x32xf32> -> vector<81x32xf32>
    %72 = arith.addf %67, %71 : vector<81x32xf32>
    %73 = vector.extract_strided_slice %66 {offsets = [0, 64], sizes = [81, 32], strides = [1, 1]} : vector<81x512xf32> to vector<81x32xf32>
    %74 = vector.extract_strided_slice %73 {offsets = [2, 0], sizes = [79, 32], strides = [1, 1]} : vector<81x32xf32> to vector<79x32xf32>
    %cst_33 = arith.constant 0.000000e+00 : f32
    %75 = vector.broadcast %cst_33 : f32 to vector<2x32xf32>
    %76 = tpu.concatenate %74, %75 in 0 : vector<79x32xf32>, vector<2x32xf32> -> vector<81x32xf32>
    %77 = arith.addf %72, %76 : vector<81x32xf32>
    %78 = vector.extract_strided_slice %66 {offsets = [0, 96], sizes = [81, 32], strides = [1, 1]} : vector<81x512xf32> to vector<81x32xf32>
    %79 = vector.extract_strided_slice %78 {offsets = [3, 0], sizes = [78, 32], strides = [1, 1]} : vector<81x32xf32> to vector<78x32xf32>
    %cst_34 = arith.constant 0.000000e+00 : f32
    %80 = vector.broadcast %cst_34 : f32 to vector<3x32xf32>
    %81 = tpu.concatenate %79, %80 in 0 : vector<78x32xf32>, vector<3x32xf32> -> vector<81x32xf32>
    %82 = arith.addf %77, %81 : vector<81x32xf32>
    %83 = vector.extract_strided_slice %66 {offsets = [0, 128], sizes = [81, 32], strides = [1, 1]} : vector<81x512xf32> to vector<81x32xf32>
    %84 = vector.extract_strided_slice %83 {offsets = [9, 0], sizes = [72, 32], strides = [1, 1]} : vector<81x32xf32> to vector<72x32xf32>
    %cst_35 = arith.constant 0.000000e+00 : f32
    %85 = vector.broadcast %cst_35 : f32 to vector<9x32xf32>
    %86 = tpu.concatenate %84, %85 in 0 : vector<72x32xf32>, vector<9x32xf32> -> vector<81x32xf32>
    %87 = arith.addf %82, %86 : vector<81x32xf32>
    %88 = vector.extract_strided_slice %66 {offsets = [0, 160], sizes = [81, 32], strides = [1, 1]} : vector<81x512xf32> to vector<81x32xf32>
    %89 = vector.extract_strided_slice %88 {offsets = [10, 0], sizes = [71, 32], strides = [1, 1]} : vector<81x32xf32> to vector<71x32xf32>
    %cst_36 = arith.constant 0.000000e+00 : f32
    %90 = vector.broadcast %cst_36 : f32 to vector<10x32xf32>
    %91 = tpu.concatenate %89, %90 in 0 : vector<71x32xf32>, vector<10x32xf32> -> vector<81x32xf32>
    %92 = arith.addf %87, %91 : vector<81x32xf32>
    %93 = vector.extract_strided_slice %66 {offsets = [0, 192], sizes = [81, 32], strides = [1, 1]} : vector<81x512xf32> to vector<81x32xf32>
    %94 = vector.extract_strided_slice %93 {offsets = [11, 0], sizes = [70, 32], strides = [1, 1]} : vector<81x32xf32> to vector<70x32xf32>
    %cst_37 = arith.constant 0.000000e+00 : f32
    %95 = vector.broadcast %cst_37 : f32 to vector<11x32xf32>
    %96 = tpu.concatenate %94, %95 in 0 : vector<70x32xf32>, vector<11x32xf32> -> vector<81x32xf32>
    %97 = arith.addf %92, %96 : vector<81x32xf32>
    %98 = vector.extract_strided_slice %66 {offsets = [0, 224], sizes = [81, 32], strides = [1, 1]} : vector<81x512xf32> to vector<81x32xf32>
    %99 = vector.extract_strided_slice %98 {offsets = [12, 0], sizes = [69, 32], strides = [1, 1]} : vector<81x32xf32> to vector<69x32xf32>
    %cst_38 = arith.constant 0.000000e+00 : f32
    %100 = vector.broadcast %cst_38 : f32 to vector<12x32xf32>
    %101 = tpu.concatenate %99, %100 in 0 : vector<69x32xf32>, vector<12x32xf32> -> vector<81x32xf32>
    %102 = arith.addf %97, %101 : vector<81x32xf32>
    %103 = vector.extract_strided_slice %66 {offsets = [0, 256], sizes = [81, 32], strides = [1, 1]} : vector<81x512xf32> to vector<81x32xf32>
    %104 = vector.extract_strided_slice %103 {offsets = [18, 0], sizes = [63, 32], strides = [1, 1]} : vector<81x32xf32> to vector<63x32xf32>
    %cst_39 = arith.constant 0.000000e+00 : f32
    %105 = vector.broadcast %cst_39 : f32 to vector<18x32xf32>
    %106 = tpu.concatenate %104, %105 in 0 : vector<63x32xf32>, vector<18x32xf32> -> vector<81x32xf32>
    %107 = arith.addf %102, %106 : vector<81x32xf32>
    %108 = vector.extract_strided_slice %66 {offsets = [0, 288], sizes = [81, 32], strides = [1, 1]} : vector<81x512xf32> to vector<81x32xf32>
    %109 = vector.extract_strided_slice %108 {offsets = [19, 0], sizes = [62, 32], strides = [1, 1]} : vector<81x32xf32> to vector<62x32xf32>
    %cst_40 = arith.constant 0.000000e+00 : f32
    %110 = vector.broadcast %cst_40 : f32 to vector<19x32xf32>
    %111 = tpu.concatenate %109, %110 in 0 : vector<62x32xf32>, vector<19x32xf32> -> vector<81x32xf32>
    %112 = arith.addf %107, %111 : vector<81x32xf32>
    %113 = vector.extract_strided_slice %66 {offsets = [0, 320], sizes = [81, 32], strides = [1, 1]} : vector<81x512xf32> to vector<81x32xf32>
    %114 = vector.extract_strided_slice %113 {offsets = [20, 0], sizes = [61, 32], strides = [1, 1]} : vector<81x32xf32> to vector<61x32xf32>
    %cst_41 = arith.constant 0.000000e+00 : f32
    %115 = vector.broadcast %cst_41 : f32 to vector<20x32xf32>
    %116 = tpu.concatenate %114, %115 in 0 : vector<61x32xf32>, vector<20x32xf32> -> vector<81x32xf32>
    %117 = arith.addf %112, %116 : vector<81x32xf32>
    %118 = vector.extract_strided_slice %66 {offsets = [0, 352], sizes = [81, 32], strides = [1, 1]} : vector<81x512xf32> to vector<81x32xf32>
    %119 = vector.extract_strided_slice %118 {offsets = [21, 0], sizes = [60, 32], strides = [1, 1]} : vector<81x32xf32> to vector<60x32xf32>
    %cst_42 = arith.constant 0.000000e+00 : f32
    %120 = vector.broadcast %cst_42 : f32 to vector<21x32xf32>
    %121 = tpu.concatenate %119, %120 in 0 : vector<60x32xf32>, vector<21x32xf32> -> vector<81x32xf32>
    %122 = arith.addf %117, %121 : vector<81x32xf32>
    %123 = vector.extract_strided_slice %66 {offsets = [0, 384], sizes = [81, 32], strides = [1, 1]} : vector<81x512xf32> to vector<81x32xf32>
    %124 = vector.extract_strided_slice %123 {offsets = [27, 0], sizes = [54, 32], strides = [1, 1]} : vector<81x32xf32> to vector<54x32xf32>
    %cst_43 = arith.constant 0.000000e+00 : f32
    %125 = vector.broadcast %cst_43 : f32 to vector<27x32xf32>
    %126 = tpu.concatenate %124, %125 in 0 : vector<54x32xf32>, vector<27x32xf32> -> vector<81x32xf32>
    %127 = arith.addf %122, %126 : vector<81x32xf32>
    %128 = vector.extract_strided_slice %66 {offsets = [0, 416], sizes = [81, 32], strides = [1, 1]} : vector<81x512xf32> to vector<81x32xf32>
    %129 = vector.extract_strided_slice %128 {offsets = [28, 0], sizes = [53, 32], strides = [1, 1]} : vector<81x32xf32> to vector<53x32xf32>
    %cst_44 = arith.constant 0.000000e+00 : f32
    %130 = vector.broadcast %cst_44 : f32 to vector<28x32xf32>
    %131 = tpu.concatenate %129, %130 in 0 : vector<53x32xf32>, vector<28x32xf32> -> vector<81x32xf32>
    %132 = arith.addf %127, %131 : vector<81x32xf32>
    %133 = vector.extract_strided_slice %66 {offsets = [0, 448], sizes = [81, 32], strides = [1, 1]} : vector<81x512xf32> to vector<81x32xf32>
    %134 = vector.extract_strided_slice %133 {offsets = [29, 0], sizes = [52, 32], strides = [1, 1]} : vector<81x32xf32> to vector<52x32xf32>
    %cst_45 = arith.constant 0.000000e+00 : f32
    %135 = vector.broadcast %cst_45 : f32 to vector<29x32xf32>
    %136 = tpu.concatenate %134, %135 in 0 : vector<52x32xf32>, vector<29x32xf32> -> vector<81x32xf32>
    %137 = arith.addf %132, %136 : vector<81x32xf32>
    %138 = vector.extract_strided_slice %66 {offsets = [0, 480], sizes = [81, 32], strides = [1, 1]} : vector<81x512xf32> to vector<81x32xf32>
    %139 = vector.extract_strided_slice %138 {offsets = [30, 0], sizes = [51, 32], strides = [1, 1]} : vector<81x32xf32> to vector<51x32xf32>
    %cst_46 = arith.constant 0.000000e+00 : f32
    %140 = vector.broadcast %cst_46 : f32 to vector<30x32xf32>
    %141 = tpu.concatenate %139, %140 in 0 : vector<51x32xf32>, vector<30x32xf32> -> vector<81x32xf32>
    %142 = arith.addf %137, %141 : vector<81x32xf32>
    %143 = vector.broadcast %10 : vector<1x32xf32> to vector<81x32xf32>
    %144 = arith.addf %142, %143 : vector<81x32xf32>
    %cst_47 = arith.constant 0.000000e+00 : f32
    %145 = vector.broadcast %cst_47 : f32 to vector<81x32xf32>
    %146 = arith.maximumf %144, %145 : vector<81x32xf32>
    %147 = arith.truncf %146 : vector<81x32xf32> to vector<81x32xbf16>
    %cst_48 = arith.constant dense<0.000000e+00> : vector<81x512xf32>
    %148 = tpu.matmul %147, %6, %cst_48 {dimension_numbers = #tpu.dot_dimension_numbers<[1], [0], [0], [1], [0, 0, 1, 1], [], []>} : vector<81x32xbf16>, vector<32x512xbf16>, vector<81x512xf32> -> vector<81x512xf32>
    %149 = vector.extract_strided_slice %148 {offsets = [0, 0], sizes = [1, 32], strides = [1, 1]} : vector<81x512xf32> to vector<1x32xf32>
    %150 = arith.addf %11, %149 : vector<1x32xf32>
    %151 = vector.extract_strided_slice %148 {offsets = [1, 32], sizes = [1, 32], strides = [1, 1]} : vector<81x512xf32> to vector<1x32xf32>
    %152 = arith.addf %150, %151 : vector<1x32xf32>
    %153 = vector.extract_strided_slice %148 {offsets = [2, 64], sizes = [1, 32], strides = [1, 1]} : vector<81x512xf32> to vector<1x32xf32>
    %154 = arith.addf %152, %153 : vector<1x32xf32>
    %155 = vector.extract_strided_slice %148 {offsets = [3, 96], sizes = [1, 32], strides = [1, 1]} : vector<81x512xf32> to vector<1x32xf32>
    %156 = arith.addf %154, %155 : vector<1x32xf32>
    %157 = vector.extract_strided_slice %148 {offsets = [9, 128], sizes = [1, 32], strides = [1, 1]} : vector<81x512xf32> to vector<1x32xf32>
    %158 = arith.addf %156, %157 : vector<1x32xf32>
    %159 = vector.extract_strided_slice %148 {offsets = [10, 160], sizes = [1, 32], strides = [1, 1]} : vector<81x512xf32> to vector<1x32xf32>
    %160 = arith.addf %158, %159 : vector<1x32xf32>
    %161 = vector.extract_strided_slice %148 {offsets = [11, 192], sizes = [1, 32], strides = [1, 1]} : vector<81x512xf32> to vector<1x32xf32>
    %162 = arith.addf %160, %161 : vector<1x32xf32>
    %163 = vector.extract_strided_slice %148 {offsets = [12, 224], sizes = [1, 32], strides = [1, 1]} : vector<81x512xf32> to vector<1x32xf32>
    %164 = arith.addf %162, %163 : vector<1x32xf32>
    %165 = vector.extract_strided_slice %148 {offsets = [18, 256], sizes = [1, 32], strides = [1, 1]} : vector<81x512xf32> to vector<1x32xf32>
    %166 = arith.addf %164, %165 : vector<1x32xf32>
    %167 = vector.extract_strided_slice %148 {offsets = [19, 288], sizes = [1, 32], strides = [1, 1]} : vector<81x512xf32> to vector<1x32xf32>
    %168 = arith.addf %166, %167 : vector<1x32xf32>
    %169 = vector.extract_strided_slice %148 {offsets = [20, 320], sizes = [1, 32], strides = [1, 1]} : vector<81x512xf32> to vector<1x32xf32>
    %170 = arith.addf %168, %169 : vector<1x32xf32>
    %171 = vector.extract_strided_slice %148 {offsets = [21, 352], sizes = [1, 32], strides = [1, 1]} : vector<81x512xf32> to vector<1x32xf32>
    %172 = arith.addf %170, %171 : vector<1x32xf32>
    %173 = vector.extract_strided_slice %148 {offsets = [27, 384], sizes = [1, 32], strides = [1, 1]} : vector<81x512xf32> to vector<1x32xf32>
    %174 = arith.addf %172, %173 : vector<1x32xf32>
    %175 = vector.extract_strided_slice %148 {offsets = [28, 416], sizes = [1, 32], strides = [1, 1]} : vector<81x512xf32> to vector<1x32xf32>
    %176 = arith.addf %174, %175 : vector<1x32xf32>
    %177 = vector.extract_strided_slice %148 {offsets = [29, 448], sizes = [1, 32], strides = [1, 1]} : vector<81x512xf32> to vector<1x32xf32>
    %178 = arith.addf %176, %177 : vector<1x32xf32>
    %179 = vector.extract_strided_slice %148 {offsets = [30, 480], sizes = [1, 32], strides = [1, 1]} : vector<81x512xf32> to vector<1x32xf32>
    %180 = arith.addf %178, %179 : vector<1x32xf32>
    %c0_49 = arith.constant 0 : index
    %c0_50 = arith.constant 0 : index
    %c0_51 = arith.constant 0 : index
    %181 = vector.load %arg2[%c0_49, %c0_50, %c0_51] : memref<1x1x64xf32, #tpu.memory_space<vmem>>, vector<1x1x64xf32>
    %182 = vector.shape_cast %181 : vector<1x1x64xf32> to vector<1x64xf32>
    %183 = vector.extract_strided_slice %182 {offsets = [0, 0], sizes = [1, 32], strides = [1, 1]} : vector<1x64xf32> to vector<1x32xf32>
    %184 = vector.extract_strided_slice %182 {offsets = [0, 32], sizes = [1, 32], strides = [1, 1]} : vector<1x64xf32> to vector<1x32xf32>
    %185 = tpu.concatenate %180, %183 in 1 : vector<1x32xf32>, vector<1x32xf32> -> vector<1x64xf32>
    %186 = arith.truncf %185 : vector<1x64xf32> to vector<1x64xbf16>
    %cst_52 = arith.constant dense<0.000000e+00> : vector<1x128xf32>
    %187 = tpu.matmul %186, %3, %cst_52 {dimension_numbers = #tpu.dot_dimension_numbers<[1], [0], [0], [1], [0, 0, 1, 1], [], []>} : vector<1x64xbf16>, vector<64x128xbf16>, vector<1x128xf32> -> vector<1x128xf32>
    %188 = arith.addf %187, %12 : vector<1x128xf32>
    %189 = vector.extract_strided_slice %188 {offsets = [0, 0], sizes = [1, 32], strides = [1, 1]} : vector<1x128xf32> to vector<1x32xf32>
    %190 = arith.negf %189 : vector<1x32xf32>
    %191 = math.exp %190 : vector<1x32xf32>
    %cst_53 = arith.constant 1.000000e+00 : f32
    %192 = vector.broadcast %cst_53 : f32 to vector<1x32xf32>
    %193 = arith.addf %192, %191 : vector<1x32xf32>
    %194 = arith.divf %192, %193 : vector<1x32xf32>
    %195 = vector.extract_strided_slice %188 {offsets = [0, 32], sizes = [1, 32], strides = [1, 1]} : vector<1x128xf32> to vector<1x32xf32>
    %196 = arith.negf %195 : vector<1x32xf32>
    %197 = math.exp %196 : vector<1x32xf32>
    %cst_54 = arith.constant 1.000000e+00 : f32
    %198 = vector.broadcast %cst_54 : f32 to vector<1x32xf32>
    %199 = arith.addf %198, %197 : vector<1x32xf32>
    %200 = arith.divf %198, %199 : vector<1x32xf32>
    %201 = vector.extract_strided_slice %188 {offsets = [0, 64], sizes = [1, 32], strides = [1, 1]} : vector<1x128xf32> to vector<1x32xf32>
    %202 = math.tanh %201 : vector<1x32xf32>
    %203 = vector.extract_strided_slice %188 {offsets = [0, 96], sizes = [1, 32], strides = [1, 1]} : vector<1x128xf32> to vector<1x32xf32>
    %204 = arith.negf %203 : vector<1x32xf32>
    %205 = math.exp %204 : vector<1x32xf32>
    %cst_55 = arith.constant 1.000000e+00 : f32
    %206 = vector.broadcast %cst_55 : f32 to vector<1x32xf32>
    %207 = arith.addf %206, %205 : vector<1x32xf32>
    %208 = arith.divf %206, %207 : vector<1x32xf32>
    %209 = arith.mulf %200, %184 : vector<1x32xf32>
    %210 = arith.mulf %194, %202 : vector<1x32xf32>
    %211 = arith.addf %209, %210 : vector<1x32xf32>
    %212 = math.tanh %211 : vector<1x32xf32>
    %213 = arith.mulf %208, %212 : vector<1x32xf32>
    %214 = arith.truncf %213 : vector<1x32xf32> to vector<1x32xbf16>
    %cst_56 = arith.constant dense<0.000000e+00> : vector<1x128xf32>
    %215 = tpu.matmul %214, %4, %cst_56 {dimension_numbers = #tpu.dot_dimension_numbers<[1], [0], [0], [1], [0, 0, 1, 1], [], []>} : vector<1x32xbf16>, vector<32x128xbf16>, vector<1x128xf32> -> vector<1x128xf32>
    %216 = arith.addf %215, %13 : vector<1x128xf32>
    %cst_57 = arith.constant 0.000000e+00 : f32
    %217 = vector.broadcast %cst_57 : f32 to vector<1x64xf32>
    %218 = tpu.concatenate %216, %213, %211, %217 in 1 : vector<1x128xf32>, vector<1x32xf32>, vector<1x32xf32>, vector<1x64xf32> -> vector<1x256xf32>
    %c0_58 = arith.constant 0 : index
    %c0_59 = arith.constant 0 : index
    %c0_60 = arith.constant 0 : index
    %219 = vector.load %arg6[%c0_58, %c0_59, %c0_60] : memref<1x1x256xf32, #tpu.memory_space<vmem>>, vector<1x1x256xf32>
    %220 = vector.shape_cast %219 : vector<1x1x256xf32> to vector<1x256xf32>
    %221 = vector.shape_cast %218 : vector<1x256xf32> to vector<1x1x256xf32>
    tpu.vector_store %arg6[%c0_58, %c0_59, %c0_60], %221 {strides = array<i32>} : memref<1x1x256xf32, #tpu.memory_space<vmem>>, vector<1x1x256xf32>,
    return
  }
  func.func @transform_0(%arg0: i32) -> (i32, i32, i32) {
    %c0_i32 = arith.constant 0 : i32
    %c0_i32_0 = arith.constant 0 : i32
    %c0_i32_1 = arith.constant 0 : i32
    return %arg0, %c0_i32, %c0_i32_0 : i32, i32, i32
  }
  func.func @transform_1(%arg0: i32) -> (i32, i32, i32) {
    %c0_i32 = arith.constant 0 : i32
    %c0_i32_0 = arith.constant 0 : i32
    %c0_i32_1 = arith.constant 0 : i32
    return %arg0, %c0_i32, %c0_i32_0 : i32, i32, i32
  }
  func.func @transform_2(%arg0: i32) -> (i32, i32) {
    %c0_i32 = arith.constant 0 : i32
    %c0_i32_0 = arith.constant 0 : i32
    %c0_i32_1 = arith.constant 0 : i32
    return %c0_i32, %c0_i32_0 : i32, i32
  }
  func.func @transform_3(%arg0: i32) -> (i32, i32) {
    %c0_i32 = arith.constant 0 : i32
    %c0_i32_0 = arith.constant 0 : i32
    %c0_i32_1 = arith.constant 0 : i32
    return %c0_i32, %c0_i32_0 : i32, i32
  }
  func.func @transform_4(%arg0: i32) -> (i32, i32) {
    %c0_i32 = arith.constant 0 : i32
    %c0_i32_0 = arith.constant 0 : i32
    %c0_i32_1 = arith.constant 0 : i32
    return %c0_i32, %c0_i32_0 : i32, i32
  }
  func.func @transform_5(%arg0: i32) -> (i32, i32, i32) {
    %c0_i32 = arith.constant 0 : i32
    %c0_i32_0 = arith.constant 0 : i32
    %c0_i32_1 = arith.constant 0 : i32
    return %arg0, %c0_i32, %c0_i32_0 : i32, i32, i32
  }
}

</mosaic_0001>

<bundles_post_ra>
// kernel: forward.1
= control target key start
LH: loop header
LB: loop body
LE: loop exit
PB: predicated region body
PF: predicated region fallthrough
CT: control target
= control target key end

     0   :  { %s3004_s18 = smov 0   ;;  %s4411_s0 = inlined_call_operand.vmem [shape: bf16[2,81,16], index: 0, kind: input, shape index: {}]   ;;  %s4412_s1 = inlined_call_operand.vmem [shape: f32[2,1,64], index: 1, kind: input, shape index: {}]   ;;  %s4413_s2 = inlined_call_operand.vmem [shape: bf16[160,128], index: 2, kind: input, shape index: {}]   ;;  %s4414_s3 = inlined_call_operand.vmem [shape: bf16[64,512], index: 3, kind: input, shape index: {}]   ;;  %s4415_s4 = inlined_call_operand.vmem [shape: f32[8,128], index: 4, kind: input, shape index: {}]   ;;  %s4416_s5 = inlined_call_operand.vmem [shape: f32[2,1,256], index: 5, kind: output, shape index: {}]  }
   0x1 LB: > { %s2711_s19 = sadd.s32 4294967295, %s2965_s18   ;;  %p2715_p0 = scmp.ge.s32.totalorder %s2965_s18, 1  ;;  %s2965_s18 = sphi %s3004_s18, %s15_s18  }
   0x2   : > { %p195_p1 = scmp.lt.s32.totalorder %s2965_s18, 3 }
   0x4   : > { %p196_p2 = pnand %p2715_p0, %p195_p1 }
   0x6   : > { %199 = sbr.rel (%p196_p2) target bundleno = 2560 (0xa00), region = 40 }
   0xb   : > { %v2911_v0 = vld [vmem:[%s4413_s2] sm:$0xff]   ;;  %p225_p3 = scmp.lt.s32.totalorder %s2711_s19, 1  ;;  %vm330_vm0 = vcmask 130048   ;;  %v2918_v7 = vld [vmem:[%s4413_s2 + $0x8] sm:$0xff]   ;;  %vm561_vm1 = vcmask 1046528   ;;  %s2967_s30 = smov 96  }
   0xc   : > { %2831 = vmatprep.subr.bf16.mxu0 %v2911_v0  ;;  %2845 = vmatprep.subr.bf16.mxu1 %v2918_v7  ;;  %v2718_v10 = vld [vmem:[%s4415_s4] ss:$0 sm:$0xff]  ;;  %s2968_s6 = smov 64   ;;  %vm669_vm2 = vcmask 1045504   ;;  %s2969_s9 = smov 32   ;;  %vm777_vm3 = vcmask 261120  }
   0xd   : > { %s4598_s19 = smov (!%p225_p3, %s2711_s19), 1  ;;  %2832 = vmatpush3.bf16.msra.mxu0 %v2911_v0  ;;  %2846 = vmatpush3.bf16.msra.mxu1 %v2918_v7  ;;  %vm1451_vm4 = vcmask 1044480   ;;  %vm1686_vm5 = vcmask 1043456   ;;  %vm1903_vm6 = vcmask 1042432   ;;  %vm2101_vm7 = vcmask 1041408  }
   0xe   : > { %s2895_s22 = smul.u32 44, %s4598_s19  ;;  %vm2972_vm8 = vmmov 0   ;;  %vm2493_vm9 = vcmask 523264  }
  0x10   : > { %s229_s25 = scalar_lea.vmem %s4411_s0, %s2895_s22  ;;  %s232_s22 = scalar_lea.vmem %s4412_s1, %s4598_s19 }
  0x11   : > { %v2912_v1 = vld [vmem:[%s229_s25] sm:$0xff]   ;;  %v2913_v2 = vld [vmem:[%s229_s25 + $0x8] sm:$0xff]   ;;  %v2914_v3 = vld [vmem:[%s229_s25 + $0x10] sm:$0xff]  }
  0x12   : > { %2833 = vmatprep.mubr.msk.bf16.mxu0 %vm330_vm0, %v2912_v1  ;;  %v2915_v4 = vld [vmem:[%s229_s25 + $0x18] sm:$0xff]   ;;  %v2916_v5 = vld [vmem:[%s229_s25 + $0x20] sm:$0xff]   ;;  %v2917_v6 = vld [vmem:[%s229_s25 + $0x28] ss:$0 sps:$4 sm:$0x11]  }
  0x13   : > { %2834 = vmatmul.mubr.msk.bf16.vlgmr.msra.gmra.mxu0 %vm330_vm0, %v2913_v2 }
  0x14   : > { %2837 = vmatprep.mubr.msk.bf16.mxu0 %vm330_vm0, %v2914_v3 }
  0x1b   : > { %2838 = vmatmul.mubr.msk.bf16.gmra.mxu0 %vm330_vm0, %v2915_v4  ;;  %v2919_v4 = vld [vmem:[%s4413_s2 + $0x18] sm:$0xff]  }
  0x1c   : > { %2841 = vmatprep.mubr.msk.bf16.mxu0 %vm330_vm0, %v2916_v5  ;;  %2859 = vmatprep.subr.bf16.mxu0 %v2919_v4 }
  0x1d   : > { %2860 = vmatpush3.bf16.msra.mxu0 %v2919_v4 }
  0x23   : > { %2842 = vmatmul.mubr.msk.bf16.gmra.mxu0 %vm330_vm0, %v2917_v6 }
  0xd3   : > { %v2835_v8 = vpop.f32.mrf.mxu0 }
  0xd4   : > { %v392_v14 = vadd.f32 %v2835_v8, %v2718_v10 }
  0xd5   : > { %v383_v9 = vpop.f32.mrf.mxu0 }
  0xd6   : > { %v384_v12 = vadd.f32 %v2718_v10, %v383_v9  ;;  %v431_v21 = vmax.f32 %v392_v14, 0.0 }
  0xd7   : > { %v2836_v11 = vpop.f32.mrf.mxu0 }
  0xd8   : > { %v395_v13 = vadd.f32 %v2836_v11, %v2718_v10  ;;  %v429_v19 = vmax.f32 %v384_v12, 0.0 }
  0xd9   : > { %v386_v15 = vpop.f32.mrf.mxu0 }
  0xda   : > { %v387_v16 = vadd.f32 %v2718_v10, %v386_v15  ;;  %v432_v17 = vmax.f32 %v395_v13, 0.0  ;;  %v2920_v13 = vld [vmem:[%s4413_s2 + $0x10] sm:$0xff]  }
  0xdb   : > { %v2839_v18 = vpop.f32.mrf.mxu0  ;;  %2861 = vmatprep.subr.bf16.mxu0 %v2920_v13 }
  0xdc   : > { %v430_v20 = vmax.f32 %v387_v16, 0.0  ;;  %v408_v22 = vadd.f32 %v2839_v18, %v2718_v10  ;;  %v441_v26 = vpack.c.bf16 %v432_v17, %v431_v21  ;;  %2862 = vmatpush3.bf16.msra.mxu0 %v2920_v13 }
  0xdd   : > { %v399_v23 = vpop.f32.mrf.mxu0 }
  0xde   : > { %v400_v24 = vadd.f32 %v2718_v10, %v399_v23  ;;  %v440_v25 = vpack.c.bf16 %v430_v20, %v429_v19  ;;  %v435_v29 = vmax.f32 %v408_v22, 0.0 }
  0xdf   : > { %v2840_v27 = vpop.f32.mrf.mxu0 }
  0xe0   : > { %v411_v28 = vadd.f32 %v2840_v27, %v2718_v10  ;;  %2847 = vmatprep.mubr.msk.bf16.mxu1 %vm330_vm0, %v440_v25  ;;  %v433_v31 = vmax.f32 %v400_v24, 0.0 }
  0xe1   : > { %v402_v30 = vpop.f32.mrf.mxu0  ;;  %2848 = vmatmul.mubr.msk.bf16.vlgmr.msra.gmra.mxu1 %vm330_vm0, %v441_v26 }
  0xe2   : > { %v436_v32 = vmax.f32 %v411_v28, 0.0  ;;  %v403_v33 = vadd.f32 %v2718_v10, %v402_v30 }
  0xe3   : > { %v2843_v34 = vpop.f32.mrf.mxu0 }
  0xe4   : > { %v434_v35 = vmax.f32 %v403_v33, 0.0  ;;  %v443_v36 = vpack.c.bf16 %v436_v32, %v435_v29  ;;  %v424_v37 = vadd.f32 %v2843_v34, %v2718_v10 }
  0xe5   : > { %v415_v38 = vpop.f32.mrf.mxu0 }
  0xe6   : > { %v442_v39 = vpack.c.bf16 %v434_v35, %v433_v31  ;;  %v416_v40 = vadd.f32 %v2718_v10, %v415_v38  ;;  %v439_v42 = vmax.f32 %v424_v37, 0.0  ;;  %v4423_v38 = vmov 0.0  }
  0xe7   : > { %v2844_v41 = vpop.f32.mrf.mxu0 }
  0xe8   : > { %2851 = vmatprep.mubr.msk.bf16.mxu1 %vm330_vm0, %v442_v39  ;;  %v437_v44 = vmax.f32 %v416_v40, 0.0  ;;  %v445_v47 = vpack.c.bf16 %v439_v42, %v439_v42 }
  0xe9   : > { %v418_v43 = vpop.f32.mrf.mxu0  ;;  %2852 = vmatmul.mubr.msk.bf16.gmra.mxu1 %vm330_vm0, %v443_v36 }
  0xea   : > { %v419_v45 = vadd.f32 %v2718_v10, %v418_v43 }
  0xec   : > { %v438_v46 = vmax.f32 %v419_v45, 0.0 }
  0xee   : > { %v444_v48 = vpack.c.bf16 %v438_v46, %v437_v44 }
  0xf0   : > { %2855 = vmatprep.mubr.msk.bf16.mxu1 %vm330_vm0, %v444_v48 }
  0xf1   : > { %2856 = vmatmul.mubr.msk.bf16.gmra.mxu1 %vm330_vm0, %v445_v47 }
 0x1a1   : > { %v3039_v49 = vpop.f32.mrf.mxu1 }
 0x1a2   : > { %v565_v52 = vrot.slane %v3039_v49, 1  ;;  %v671_v63 = vrot.slane %v3039_v49, 2 }
 0x1a3   : > { %v3041_v50 = vpop.f32.mrf.mxu1 }
 0x1a4   : > { %v562_v55 = vrot.slane %v3041_v50, 1 }
 0x1a5   : > { %v3043_v51 = vpop.f32.mrf.mxu1 }
 0x1a6   : > { %v567_v53 = vrot.slane %v3043_v51, 1  ;;  %v673_v61 = vrot.slane %v3043_v51, 2 }
 0x1a7   : > { %v3047_v54 = vpop.f32.mrf.mxu1 }
 0x1a8   : > { %v563_v56 = vrot.slane %v3047_v54, 1  ;;  %v568_v57 = vsel %vm561_vm1, %v565_v52, %v567_v53  ;;  %v674_v3 = vsel %vm669_vm2, %v671_v63, %v673_v61  ;;  %v670_v6 = vrot.slane %v3047_v54, 2 }
 0x1a9   : > { %588 = vrot.lane.b32.xlu1 %v568_v57, %s2967_s30  ;;  %v3053_v58 = vpop.f32.mrf.mxu1 }
 0x1aa   : > { %v564_v59 = vsel %vm561_vm1, %v562_v55, %v563_v56  ;;  %v566_v0 = vsel %vm561_vm1, %v563_v56, %v565_v52  ;;  %v573_v11 = vrot.slane %v3053_v58, 1  ;;  %v672_v12 = vsel %vm669_vm2, %v670_v6, %v671_v63  ;;  %v3147_v55 = vld [vmem:[%s4415_s4 + $0x1] ss:$0 sm:$0xff] }
 0x1ab   : > { %584 = vrot.lane.b32.xlu0 %v564_v59, %s2967_s30  ;;  %v3057_v60 = vpop.f32.mrf.mxu1  ;;  %v679_v16 = vrot.slane %v3053_v58, 2 }
 0x1ac   : > { %v569_v2 = vrot.slane %v3057_v60, 1  ;;  %v675_v17 = vrot.slane %v3057_v60, 2 }
 0x1ad   : > { %630 = vrot.lane.b32.xlu1 %v568_v57, %s2968_s6  ;;  %v3061_v62 = vpop.f32.mrf.mxu1 }
 0x1ae   : > { %v575_v8 = vrot.slane %v3061_v62, 1  ;;  %v570_v9 = vsel %vm561_vm1, %v567_v53, %v569_v2  ;;  %v681_v14 = vrot.slane %v3061_v62, 2  ;;  %v676_v20 = vsel %vm669_vm2, %v673_v61, %v675_v17 }
 0x1af   : > { %586 = vrot.lane.b32.xlu0 %v566_v0, %s2967_s30  ;;  %v3066_v1 = vpop.f32.mrf.mxu1 }
 0x1b0   : > { %v576_v15 = vsel %vm561_vm1, %v573_v11, %v575_v8  ;;  %v571_v18 = vrot.slane %v3066_v1, 1  ;;  %v682_v19 = vsel %vm669_vm2, %v679_v16, %v681_v14  ;;  %v677_v21 = vrot.slane %v3066_v1, 2 }
 0x1b1   : > { %694 = vrot.lane.b32.xlu1 %v674_v3, %s2969_s9  ;;  %v3074_v5 = vpop.f32.mrf.mxu1 }
 0x1b2   : > { %v572_v22 = vsel %vm561_vm1, %v569_v2, %v571_v18  ;;  %v678_v23 = vsel %vm669_vm2, %v675_v17, %v677_v21  ;;  %v574_v25 = vsel %vm561_vm1, %v571_v18, %v573_v11  ;;  %v680_v29 = vsel %vm669_vm2, %v677_v21, %v679_v16 }
 0x1b3   : > { %628 = vrot.lane.b32.xlu0 %v566_v0, %s2968_s6  ;;  %v3078_v7 = vpop.f32.mrf.mxu1  ;;  %v581_v33 = vrot.slane %v3074_v5, 1  ;;  %v687_v37 = vrot.slane %v3074_v5, 2 }
 0x1b4   : > { %v577_v24 = vrot.slane %v3078_v7, 1  ;;  %v683_v32 = vrot.slane %v3078_v7, 2 }
 0x1b5   : > { %590 = vrot.lane.b32.xlu1 %v570_v9, %s2967_s30  ;;  %v2858_v10 = vpop.f32.mrf.mxu1 }
 0x1b6   : > { %v578_v28 = vsel %vm561_vm1, %v575_v8, %v577_v24  ;;  %v684_v35 = vsel %vm669_vm2, %v681_v14, %v683_v32 }
 0x1b7   : > { %692 = vrot.lane.b32.xlu0 %v672_v12, %s2969_s9  ;;  %v3109_v26 = vpop.f32.mrf.mxu1 }
 0x1b8   : > { %v579_v27 = vrot.slane %v3109_v26, 1  ;;  %v685_v30 = vrot.slane %v3109_v26, 2 }
 0x1b9   : > { %638 = vrot.lane.b32.xlu1 %v576_v15, %s2968_s6 }
 0x1ba   : > { %v580_v31 = vsel %vm561_vm1, %v577_v24, %v579_v27  ;;  %v686_v34 = vsel %vm669_vm2, %v683_v32, %v685_v30  ;;  %v582_v36 = vsel %vm561_vm1, %v579_v27, %v581_v33  ;;  %v688_v39 = vsel %vm669_vm2, %v685_v30, %v687_v37 }
 0x1bb   : > { %632 = vrot.lane.b32.xlu0 %v570_v9, %s2968_s6  ;;  %v690_v40 = vsel %vm561_vm1, %v688_v39, 0.0 }
 0x1bd   : > { %702 = vrot.lane.b32.xlu1 %v682_v19, %s2969_s9 }
 0x1bf   : > { %696 = vrot.lane.b32.xlu0 %v676_v20, %s2969_s9 }
 0x1c1   : > { %634 = vrot.lane.b32.xlu1 %v572_v22, %s2968_s6 }
 0x1c3   : > { %596 = vrot.lane.b32.xlu0 %v576_v15, %s2967_s30 }
 0x1c5   : > { %698 = vrot.lane.b32.xlu1 %v678_v23, %s2969_s9 }
 0x1c7   : > { %592 = vrot.lane.b32.xlu0 %v572_v22, %s2967_s30 }
 0x1c9   : > { %594 = vrot.lane.b32.xlu1 %v574_v25, %s2967_s30 }
 0x1cb   : > { %636 = vrot.lane.b32.xlu0 %v574_v25, %s2968_s6 }
 0x1cd   : > { %598 = vrot.lane.b32.xlu1 %v578_v28, %s2967_s30 }
 0x1cf   : > { %700 = vrot.lane.b32.xlu0 %v680_v29, %s2969_s9 }
 0x1d1   : > { %642 = vrot.lane.b32.xlu1 %v580_v31, %s2968_s6 }
 0x1d3   : > { %640 = vrot.lane.b32.xlu0 %v578_v28, %s2968_s6 }
 0x1d5   : > { %706 = vrot.lane.b32.xlu1 %v686_v34, %s2969_s9 }
 0x1d7   : > { %704 = vrot.lane.b32.xlu0 %v684_v35, %s2969_s9 }
 0x1d9   : > { %602 = vrot.lane.b32.xlu1 %v582_v36, %s2967_s30 }
 0x1db   : > { %604 = vrot.lane.b32.xlu0 %v4423_v38, %s2967_s30 }
 0x1dd   : > { %644 = vrot.lane.b32.xlu1 %v582_v36, %s2968_s6 }
 0x1df   : > { %646 = vrot.lane.b32.xlu0 %v4423_v38, %s2968_s6 }
 0x1e1   : > { %708 = vrot.lane.b32.xlu1 %v690_v40, %s2969_s9 }
 0x1e3   : > { %600 = vrot.lane.b32.xlu0 %v580_v31, %s2967_s30 }
 0x1e7   : > { %710 = vrot.lane.b32.xlu0 %v4423_v38, %s2969_s9 }
 0x21b   : > { %v589_v41 = vpop.permute.xlu1 %588 }
 0x21d   : > { %v585_v42 = vpop.permute.xlu0 %584 }
 0x21e   : > { %v617_v52 = vadd.f32 %v585_v42, %v3041_v50  ;;  %v619_v50 = vadd.f32 %v3039_v49, %v589_v41 }
 0x21f   : > { %v631_v43 = vpop.permute.xlu1 %630 }
 0x221   : > { %v587_v44 = vpop.permute.xlu0 %586 }
 0x222   : > { %v618_v45 = vadd.f32 %v587_v44, %v3047_v54 }
 0x223   : > { %v695_v46 = vpop.permute.xlu1 %694 }
 0x224   : > { %v659_v47 = vadd.f32 %v631_v43, %v618_v45 }
 0x225   : > { %v629_v48 = vpop.permute.xlu0 %628 }
 0x226   : > { %v723_v53 = vadd.f32 %v695_v46, %v659_v47  ;;  %v658_v57 = vadd.f32 %v629_v48, %v617_v52 }
 0x227   : > { %v591_v56 = vpop.permute.xlu1 %590 }
 0x228   : > { %v738_v61 = vadd.f32 %v3147_v55, %v723_v53  ;;  %v620_v12 = vadd.f32 %v3043_v51, %v591_v56 }
 0x229   : > { %v693_v59 = vpop.permute.xlu0 %692 }
 0x22a   : > { %v722_v63 = vadd.f32 %v693_v59, %v658_v57  ;;  %v749_v3 = vmax.f32 %v738_v61, 0.0 }
 0x22b   : > { %v639_v0 = vpop.permute.xlu1 %638 }
 0x22c   : > { %v737_v54 = vadd.f32 %v3147_v55, %v722_v63 }
 0x22d   : > { %v633_v2 = vpop.permute.xlu0 %632 }
 0x22e   : > { %v748_v4 = vmax.f32 %v737_v54, 0.0  ;;  %v660_v10 = vadd.f32 %v633_v2, %v619_v50 }
 0x22f   : > { %v703_v6 = vpop.permute.xlu1 %702 }
 0x230   : > { %v759_v8 = vpack.c.bf16 %v749_v3, %v748_v4 }
 0x231   : > { %v697_v9 = vpop.permute.xlu0 %696 }
 0x232   : > { %2863 = vmatprep.mubr.msk.bf16.mxu0 %vm777_vm3, %v759_v8  ;;  %v724_v13 = vadd.f32 %v697_v9, %v660_v10 }
 0x233   : > { %v635_v11 = vpop.permute.xlu1 %634 }
 0x234   : > { %v661_v15 = vadd.f32 %v635_v11, %v620_v12  ;;  %v739_v17 = vadd.f32 %v3147_v55, %v724_v13 }
 0x235   : > { %v597_v14 = vpop.permute.xlu0 %596 }
 0x236   : > { %v750_v49 = vmax.f32 %v739_v17, 0.0  ;;  %v623_v37 = vadd.f32 %v3053_v58, %v597_v14  ;;  %v2923_v17 = vld [vmem:[%s4414_s3 + $0x24] ss:$16 sps:$4 sm:$0xff]  }
 0x237   : > { %v699_v16 = vpop.permute.xlu1 %698  ;;  %1149 = vmatprep.subr.bf16.mxu1 %v2923_v17 }
 0x238   : > { %v725_v18 = vadd.f32 %v699_v16, %v661_v15  ;;  %v2921_v16 = vld [vmem:[%s4414_s3 + $0x20] ss:$16 sps:$4 sm:$0xff]  }
 0x239   : > { %v593_v19 = vpop.permute.xlu0 %592  ;;  %1150 = vmatpush1.bf16.msra.mxu1 %v2921_v16 }
 0x23a   : > { %v740_v20 = vadd.f32 %v3147_v55, %v725_v18  ;;  %v621_v27 = vadd.f32 %v593_v19, %v3057_v60 }
 0x23b   : > { %v595_v21 = vpop.permute.xlu1 %594 }
 0x23c   : > { %v751_v22 = vmax.f32 %v740_v20, 0.0  ;;  %v622_v23 = vadd.f32 %v595_v21, %v3066_v1 }
 0x23d   : > { %v637_v24 = vpop.permute.xlu0 %636 }
 0x23e   : > { %v760_v25 = vpack.c.bf16 %v751_v22, %v750_v49  ;;  %v663_v51 = vadd.f32 %v639_v0, %v622_v23  ;;  %v662_v30 = vadd.f32 %v637_v24, %v621_v27  ;;  %v2929_v22 = vld [vmem:[%s4414_s3 + $0x2c] ss:$16 sps:$4 sm:$0xff]   ;;  %v2927_v27 = vld [vmem:[%s4414_s3 + $0x28] ss:$16 sps:$4 sm:$0xff]  }
 0x23f   : > { %v599_v28 = vpop.permute.xlu1 %598  ;;  %1239 = vmatprep.subr.bf16.mxu0 %v2929_v22 }
 0x240   : > { %v727_v29 = vadd.f32 %v703_v6, %v663_v51  ;;  %2864 = vmatmul.mubr.msk.bf16.vlgmr.msra.gmra.mxu0 %vm777_vm3, %v760_v25  ;;  %v624_v35 = vadd.f32 %v3061_v62, %v599_v28 }
 0x241   : > { %v701_v31 = vpop.permute.xlu0 %700  ;;  %1240 = vmatpush1.bf16.msra.mxu0 %v2927_v27 }
 0x242   : > { %v742_v32 = vadd.f32 %v3147_v55, %v727_v29  ;;  %v726_v33 = vadd.f32 %v701_v31, %v662_v30  ;;  %v2924_v29 = vld [vmem:[%s4414_s3] ss:$16 sps:$4 sm:$0xff]   ;;  %v2926_v30 = vld [vmem:[%s4414_s3 + $0x4] ss:$16 sps:$4 sm:$0xff]   ;;  %v2932_v31 = vld [vmem:[%s4414_s3 + $0xc] ss:$16 sps:$4 sm:$0xff]  }
 0x243   : > { %v643_v34 = vpop.permute.xlu1 %642  ;;  %1151 = vmatprep.subr.bf16.mxu1 %v2926_v30  ;;  %1241 = vmatprep.subr.bf16.mxu0 %v2932_v31 }
 0x244   : > { %v741_v36 = vadd.f32 %v3147_v55, %v726_v33  ;;  %v753_v60 = vmax.f32 %v742_v32, 0.0  ;;  %v665_v40 = vadd.f32 %v643_v34, %v624_v35  ;;  %v2930_v34 = vld [vmem:[%s4414_s3 + $0x8] ss:$16 sps:$4 sm:$0xff]   ;;  %1152 = vmatpush1.bf16.msra.mxu1 %v2924_v29  ;;  %v4417_v35 = vmov 0  }
 0x245   : > { %v641_v1 = vpop.permute.xlu0 %640  ;;  %1242 = vmatpush1.bf16.msra.mxu0 %v2930_v34  ;;  %1169 = vmatprep.mubr.bf16.mxu1 %v4417_v35 }
 0x246   : > { %v752_v39 = vmax.f32 %v741_v36, 0.0  ;;  %v664_v43 = vadd.f32 %v641_v1, %v623_v37 }
 0x247   : > { %v707_v41 = vpop.permute.xlu1 %706 }
 0x248   : > { %v761_v42 = vpack.c.bf16 %v753_v60, %v752_v39  ;;  %v729_v44 = vadd.f32 %v707_v41, %v665_v40 }
 0x249   : > { %v705_v45 = vpop.permute.xlu0 %704 }
 0x24a   : > { %v744_v46 = vadd.f32 %v3147_v55, %v729_v44  ;;  %v728_v47 = vadd.f32 %v705_v45, %v664_v43  ;;  %2867 = vmatprep.mubr.msk.bf16.mxu0 %vm777_vm3, %v761_v42 }
 0x24b   : > { %v603_v48 = vpop.permute.xlu1 %602 }
 0x24c   : > { %v743_v62 = vadd.f32 %v3147_v55, %v728_v47  ;;  %v755_v53 = vmax.f32 %v744_v46, 0.0  ;;  %v626_v63 = vadd.f32 %v603_v48, %v3109_v26 }
 0x24d   : > { %v3166_v52 = vpop.permute.xlu0 %604 }
 0x24e   : > { %4449 = vst [vmem:[#allocation2_spill] sm:$0xff] %v3166_v52  ;;  %v754_v58 = vmax.f32 %v743_v62, 0.0  ;;  %v627_v54 = vadd.f32 %v3074_v5, %v3166_v52 }
 0x24f   : > { %v645_v59 = vpop.permute.xlu1 %644 }
 0x250   : > { %v762_v56 = vpack.c.bf16 %v755_v53, %v754_v58 }
 0x251   : > { %v3168_v57 = vpop.permute.xlu0 %646 }
 0x252   : > { %4450 = vst [vmem:[#allocation3_spill] sm:$0xff] %v3168_v57  ;;  %2868 = vmatmul.mubr.msk.bf16.gmra.mxu0 %vm777_vm3, %v762_v56  ;;  %v667_v3 = vadd.f32 %v3168_v57, %v626_v63  ;;  %v668_v4 = vadd.f32 %v3168_v57, %v627_v54 }
 0x253   : > { %v709_v6 = vpop.permute.xlu1 %708 }
 0x255   : > { %v601_v61 = vpop.permute.xlu0 %600 }
 0x256   : > { %v625_v0 = vadd.f32 %v601_v61, %v3078_v7 }
 0x258   : > { %v666_v2 = vadd.f32 %v645_v59, %v625_v0 }
 0x259   : > { %v3177_v50 = vpop.permute.xlu0 %710 }
 0x25a   : > { %4451 = vst [vmem:[#allocation4_spill] sm:$0xff] %v3177_v50  ;;  %v730_v8 = vadd.f32 %v709_v6, %v666_v2  ;;  %v731_v9 = vadd.f32 %v3177_v50, %v667_v3  ;;  %v732_v10 = vadd.f32 %v3177_v50, %v668_v4 }
 0x25c   : > { %v745_v26 = vadd.f32 %v3147_v55, %v730_v8  ;;  %v746_v7 = vadd.f32 %v3147_v55, %v731_v9  ;;  %v747_v11 = vadd.f32 %v3147_v55, %v732_v10 }
 0x25e   : > { %v756_v5 = vmax.f32 %v745_v26, 0.0  ;;  %v757_v12 = vmax.f32 %v746_v7, 0.0  ;;  %v758_v13 = vmax.f32 %v747_v11, 0.0 }
 0x260   : > { %v763_v14 = vpack.c.bf16 %v757_v12, %v756_v5  ;;  %v764_v15 = vpack.c.bf16 %v758_v13, %v758_v13 }
 0x262   : > { %2871 = vmatprep.mubr.msk.bf16.mxu0 %vm777_vm3, %v763_v14 }
 0x263   : > { %2872 = vmatmul.mubr.msk.bf16.gmra.mxu0 %vm777_vm3, %v764_v15 }
 0x264   : > { %1259 = vmatprep.mubr.bf16.mxu0 %v4417_v35 }
 0x300   : > { %v3192_v55 = vpop.f32.mrf.mxu0 }
 0x301   : > { %v890_v20 = vrot.slane %v3192_v55, 1  ;;  %v988_v51 = vrot.slane %v3192_v55, 2 }
 0x302   : > { %v3194_v18 = vpop.f32.mrf.mxu0 }
 0x303   : > { %v887_v28 = vrot.slane %v3194_v18, 1 }
 0x304   : > { %v3196_v19 = vpop.f32.mrf.mxu0 }
 0x305   : > { %v892_v21 = vrot.slane %v3196_v19, 1  ;;  %v990_v23 = vrot.slane %v3196_v19, 2 }
 0x306   : > { %v3200_v49 = vpop.f32.mrf.mxu0 }
 0x307   : > { %v888_v24 = vrot.slane %v3200_v49, 1  ;;  %v893_v25 = vsel %vm561_vm1, %v890_v20, %v892_v21  ;;  %v991_v32 = vsel %vm669_vm2, %v988_v51, %v990_v23  ;;  %v987_v36 = vrot.slane %v3200_v49, 2 }
 0x308   : > { %951 = vrot.lane.b32.xlu0 %v893_v25, %s2968_s6  ;;  %912 = vrot.lane.b32.xlu1 %v893_v25, %s2967_s30 }
 0x309   : > { %v889_v33 = vsel %vm561_vm1, %v887_v28, %v888_v24  ;;  %v891_v1 = vsel %vm561_vm1, %v888_v24, %v890_v20  ;;  %v989_v39 = vsel %vm669_vm2, %v987_v36, %v988_v51 }
 0x30c   : > { %1011 = vrot.lane.b32.xlu0 %v991_v32, %s2969_s9  ;;  %908 = vrot.lane.b32.xlu1 %v889_v33, %s2967_s30  ;;  %v3308_v33 = vld [vmem:[%s4415_s4 + $0x2] ss:$0 sm:$0xff] }
 0x310   : > { %910 = vrot.lane.b32.xlu0 %v891_v1, %s2967_s30  ;;  %949 = vrot.lane.b32.xlu1 %v891_v1, %s2968_s6 }
 0x312   : > { %v3237_v37 = vpop.f32.mrf.mxu0 }
 0x313   : > { %v898_v58 = vrot.slane %v3237_v37, 1  ;;  %v996_v63 = vrot.slane %v3237_v37, 2 }
 0x314   : > { %1009 = vrot.lane.b32.xlu1 %v989_v39, %s2969_s9  ;;  %v3241_v60 = vpop.f32.mrf.mxu0 }
 0x315   : > { %v894_v40 = vrot.slane %v3241_v60, 1  ;;  %v992_v42 = vrot.slane %v3241_v60, 2 }
 0x316   : > { %v3244_v41 = vpop.f32.mrf.mxu0 }
 0x317   : > { %v895_v43 = vsel %vm561_vm1, %v892_v21, %v894_v40  ;;  %v993_v47 = vsel %vm669_vm2, %v990_v23, %v992_v42  ;;  %v900_v48 = vrot.slane %v3244_v41, 1  ;;  %v998_v54 = vrot.slane %v3244_v41, 2 }
 0x318   : > { %953 = vrot.lane.b32.xlu1 %v895_v43, %s2968_s6  ;;  %914 = vrot.lane.b32.xlu0 %v895_v43, %s2967_s30  ;;  %v3250_v44 = vpop.f32.mrf.mxu0 }
 0x319   : > { %v896_v45 = vrot.slane %v3250_v44, 1  ;;  %v994_v46 = vrot.slane %v3250_v44, 2  ;;  %v901_v61 = vsel %vm561_vm1, %v898_v58, %v900_v48  ;;  %v999_v6 = vsel %vm669_vm2, %v996_v63, %v998_v54 }
 0x31b   : > { %v897_v62 = vsel %vm561_vm1, %v894_v40, %v896_v45  ;;  %v995_v53 = vsel %vm669_vm2, %v992_v42, %v994_v46  ;;  %v899_v59 = vsel %vm561_vm1, %v896_v45, %v898_v58  ;;  %v997_v3 = vsel %vm669_vm2, %v994_v46, %v996_v63 }
 0x31c   : > { %1013 = vrot.lane.b32.xlu1 %v993_v47, %s2969_s9  ;;  %955 = vrot.lane.b32.xlu0 %v897_v62, %s2968_s6 }
 0x320   : > { %916 = vrot.lane.b32.xlu1 %v897_v62, %s2967_s30  ;;  %1015 = vrot.lane.b32.xlu0 %v995_v53, %s2969_s9 }
 0x323   : > { %v3263_v56 = vpop.f32.mrf.mxu0 }
 0x324   : > { %957 = vrot.lane.b32.xlu1 %v899_v59, %s2968_s6  ;;  %959 = vrot.lane.b32.xlu0 %v901_v61, %s2968_s6  ;;  %v906_v13 = vrot.slane %v3263_v56, 1  ;;  %v1004_v14 = vrot.slane %v3263_v56, 2 }
 0x325   : > { %v3270_v0 = vpop.f32.mrf.mxu0 }
 0x326   : > { %v902_v4 = vrot.slane %v3270_v0, 1  ;;  %v1000_v9 = vrot.slane %v3270_v0, 2 }
 0x327   : > { %v2874_v2 = vpop.f32.mrf.mxu0 }
 0x328   : > { %1017 = vrot.lane.b32.xlu1 %v997_v3, %s2969_s9  ;;  %918 = vrot.lane.b32.xlu0 %v899_v59, %s2967_s30  ;;  %v903_v26 = vsel %vm561_vm1, %v900_v48, %v902_v4  ;;  %v1001_v11 = vsel %vm669_vm2, %v998_v54, %v1000_v9 }
 0x329   : > { %v3278_v8 = vpop.f32.mrf.mxu0 }
 0x32a   : > { %v904_v10 = vrot.slane %v3278_v8, 1  ;;  %v1002_v7 = vrot.slane %v3278_v8, 2 }
 0x32c   : > { %920 = vrot.lane.b32.xlu1 %v901_v61, %s2967_s30  ;;  %1019 = vrot.lane.b32.xlu0 %v999_v6, %s2969_s9  ;;  %v905_v5 = vsel %vm561_vm1, %v902_v4, %v904_v10  ;;  %v1003_v12 = vsel %vm669_vm2, %v1000_v9, %v1002_v7  ;;  %v907_v15 = vsel %vm561_vm1, %v904_v10, %v906_v13 }
 0x32d   : > { %v1005_v16 = vsel %vm669_vm2, %v1002_v7, %v1004_v14 }
 0x32e   : > { %v1007_v17 = vsel %vm561_vm1, %v1005_v16, 0.0 }
 0x330   : > { %961 = vrot.lane.b32.xlu1 %v903_v26, %s2968_s6  ;;  %922 = vrot.lane.b32.xlu0 %v903_v26, %s2967_s30 }
 0x334   : > { %1021 = vrot.lane.b32.xlu1 %v1001_v11, %s2969_s9  ;;  %963 = vrot.lane.b32.xlu0 %v905_v5, %s2968_s6 }
 0x338   : > { %924 = vrot.lane.b32.xlu1 %v905_v5, %s2967_s30  ;;  %1023 = vrot.lane.b32.xlu0 %v1003_v12, %s2969_s9 }
 0x33c   : > { %965 = vrot.lane.b32.xlu1 %v907_v15, %s2968_s6  ;;  %926 = vrot.lane.b32.xlu0 %v907_v15, %s2967_s30 }
 0x340   : > { %1025 = vrot.lane.b32.xlu0 %v1007_v17, %s2969_s9 }
 0x37a   : > { %v952_v20 = vpop.permute.xlu0 %951  ;;  %v913_v21 = vpop.permute.xlu1 %912 }
 0x37e   : > { %v1012_v22 = vpop.permute.xlu0 %1011  ;;  %v909_v23 = vpop.permute.xlu1 %908 }
 0x37f   : > { %v938_v27 = vadd.f32 %v909_v23, %v3194_v18  ;;  %v940_v18 = vadd.f32 %v3192_v55, %v913_v21 }
 0x382   : > { %v911_v24 = vpop.permute.xlu0 %910  ;;  %v950_v25 = vpop.permute.xlu1 %949 }
 0x383   : > { %v939_v51 = vadd.f32 %v911_v24, %v3200_v49  ;;  %v976_v29 = vadd.f32 %v950_v25, %v938_v27 }
 0x385   : > { %v977_v28 = vadd.f32 %v952_v20, %v939_v51 }
 0x386   : > { %v1010_v30 = vpop.permute.xlu1 %1009 }
 0x387   : > { %v1037_v31 = vadd.f32 %v1012_v22, %v977_v28  ;;  %v1036_v32 = vadd.f32 %v1010_v30, %v976_v29 }
 0x389   : > { %v1052_v34 = vadd.f32 %v3308_v33, %v1037_v31  ;;  %v1051_v36 = vadd.f32 %v3308_v33, %v1036_v32  ;;  %v948_v31 = vadd.f32 %v3263_v56, %v3166_v52 }
 0x38a   : > { %v915_v1 = vpop.permute.xlu0 %914  ;;  %v954_v39 = vpop.permute.xlu1 %953 }
 0x38b   : > { %v1063_v40 = vmax.f32 %v1052_v34, 0.0  ;;  %v1062_v49 = vmax.f32 %v1051_v36, 0.0  ;;  %v978_v43 = vadd.f32 %v954_v39, %v940_v18  ;;  %v941_v47 = vadd.f32 %v3196_v19, %v915_v1 }
 0x38d   : > { %v1073_v42 = vpack.c.bf16 %v1063_v40, %v1062_v49  ;;  %v986_v40 = vadd.f32 %v948_v31, %v3168_v57 }
 0x38e   : > { %v956_v45 = vpop.permute.xlu0 %955  ;;  %v1014_v46 = vpop.permute.xlu1 %1013 }
 0x38f   : > { %v1038_v62 = vadd.f32 %v1014_v46, %v978_v43  ;;  %2757 = vmatmul.mubr.msk.bf16.vlgmr.msra.gmra.mxu1 %vm777_vm3, %v1073_v42  ;;  %2763 = vmatmul.mubr.msk.bf16.vlgmr.msra.gmra.mxu0 %vm777_vm3, %v1073_v42  ;;  %v979_v48 = vadd.f32 %v956_v45, %v941_v47 }
 0x390   : > { %1178 = vmatprep.mubr.bf16.mxu1 %v4417_v35  ;;  %1265 = vmatprep.mubr.bf16.mxu0 %v4417_v35 }
 0x391   : > { %v1053_v58 = vadd.f32 %v3308_v33, %v1038_v62 }
 0x392   : > { %v1016_v53 = vpop.permute.xlu0 %1015  ;;  %v917_v55 = vpop.permute.xlu1 %916 }
 0x393   : > { %v1039_v59 = vadd.f32 %v1016_v53, %v979_v48  ;;  %v1064_v19 = vmax.f32 %v1053_v58, 0.0  ;;  %v942_v3 = vadd.f32 %v917_v55, %v3241_v60 }
 0x395   : > { %v1054_v61 = vadd.f32 %v3308_v33, %v1039_v59 }
 0x396   : > { %v960_v63 = vpop.permute.xlu0 %959  ;;  %v958_v54 = vpop.permute.xlu1 %957 }
 0x397   : > { %v1065_v2 = vmax.f32 %v1054_v61, 0.0  ;;  %v980_v6 = vadd.f32 %v958_v54, %v942_v3 }
 0x399   : > { %v1074_v4 = vpack.c.bf16 %v1065_v2, %v1064_v19 }
 0x39a   : > { %v919_v9 = vpop.permute.xlu0 %918  ;;  %v1018_v10 = vpop.permute.xlu1 %1017 }
 0x39b   : > { %v943_v26 = vadd.f32 %v919_v9, %v3250_v44  ;;  %v1040_v7 = vadd.f32 %v1018_v10, %v980_v6  ;;  %2758 = vmatmul.mubr.msk.bf16.gmra.mxu1 %vm777_vm3, %v1074_v4  ;;  %2764 = vmatmul.mubr.msk.bf16.gmra.mxu0 %vm777_vm3, %v1074_v4 }
 0x39c   : > { %1188 = vmatprep.mubr.bf16.mxu1 %v4417_v35  ;;  %1274 = vmatprep.mubr.bf16.mxu0 %v4417_v35 }
 0x39d   : > { %v981_v11 = vadd.f32 %v960_v63, %v943_v26  ;;  %v1055_v60 = vadd.f32 %v3308_v33, %v1040_v7 }
 0x39e   : > { %v1020_v5 = vpop.permute.xlu0 %1019  ;;  %v921_v12 = vpop.permute.xlu1 %920 }
 0x39f   : > { %v1041_v13 = vadd.f32 %v1020_v5, %v981_v11  ;;  %v1066_v44 = vmax.f32 %v1055_v60, 0.0  ;;  %v944_v20 = vadd.f32 %v3237_v37, %v921_v12 }
 0x3a1   : > { %v1056_v14 = vadd.f32 %v3308_v33, %v1041_v13 }
 0x3a2   : > { %v923_v15 = vpop.permute.xlu0 %922  ;;  %v962_v16 = vpop.permute.xlu1 %961 }
 0x3a3   : > { %v1067_v17 = vmax.f32 %v1056_v14, 0.0  ;;  %v982_v22 = vadd.f32 %v962_v16, %v944_v20  ;;  %v945_v25 = vadd.f32 %v3244_v41, %v923_v15 }
 0x3a5   : > { %v1075_v21 = vpack.c.bf16 %v1067_v17, %v1066_v44 }
 0x3a6   : > { %v964_v23 = vpop.permute.xlu0 %963  ;;  %v1022_v24 = vpop.permute.xlu1 %1021 }
 0x3a7   : > { %v1042_v27 = vadd.f32 %v1022_v24, %v982_v22  ;;  %2759 = vmatmul.mubr.msk.bf16.gmra.mxu1 %vm777_vm3, %v1075_v21  ;;  %2765 = vmatmul.mubr.msk.bf16.gmra.mxu0 %vm777_vm3, %v1075_v21  ;;  %v983_v51 = vadd.f32 %v964_v23, %v945_v25 }
 0x3a8   : > { %1198 = vmatprep.mubr.bf16.mxu1 %v4417_v35  ;;  %1284 = vmatprep.mubr.bf16.mxu0 %v4417_v35 }
 0x3a9   : > { %v1057_v37 = vadd.f32 %v3308_v33, %v1042_v27 }
 0x3aa   : > { %v1024_v28 = vpop.permute.xlu0 %1023  ;;  %v925_v29 = vpop.permute.xlu1 %924 }
 0x3ab   : > { %v1043_v30 = vadd.f32 %v1024_v28, %v983_v51  ;;  %v1068_v36 = vmax.f32 %v1057_v37, 0.0  ;;  %v946_v39 = vadd.f32 %v925_v29, %v3270_v0  ;;  %v1046_v0 = vadd.f32 %v986_v40, %v3177_v50 }
 0x3ad   : > { %v1058_v41 = vadd.f32 %v3308_v33, %v1043_v30  ;;  %v1061_v55 = vadd.f32 %v3308_v33, %v1046_v0 }
 0x3ae   : > { %v927_v32 = vpop.permute.xlu0 %926  ;;  %v966_v34 = vpop.permute.xlu1 %965 }
 0x3af   : > { %v1069_v1 = vmax.f32 %v1058_v41, 0.0  ;;  %v947_v18 = vadd.f32 %v927_v32, %v3278_v8  ;;  %v984_v43 = vadd.f32 %v966_v34, %v946_v39  ;;  %v1072_v58 = vmax.f32 %v1061_v55, 0.0 }
 0x3b1   : > { %v1076_v49 = vpack.c.bf16 %v1069_v1, %v1068_v36  ;;  %v985_v42 = vadd.f32 %v947_v18, %v3168_v57  ;;  %v1078_v59 = vpack.c.bf16 %v1072_v58, %v1072_v58 }
 0x3b2   : > { %v1026_v45 = vpop.permute.xlu0 %1025 }
 0x3b3   : > { %v1045_v46 = vadd.f32 %v985_v42, %v3177_v50  ;;  %v1044_v56 = vadd.f32 %v1026_v45, %v984_v43  ;;  %2760 = vmatmul.mubr.msk.bf16.gmra.mxu1 %vm777_vm3, %v1076_v49  ;;  %2766 = vmatmul.mubr.msk.bf16.gmra.mxu0 %vm777_vm3, %v1076_v49 }
 0x3b4   : > { %1208 = vmatprep.mubr.bf16.mxu1 %v4417_v35  ;;  %1294 = vmatprep.mubr.bf16.mxu0 %v4417_v35 }
 0x3b5   : > { %v1060_v8 = vadd.f32 %v3308_v33, %v1045_v46  ;;  %v1059_v47 = vadd.f32 %v3308_v33, %v1044_v56 }
 0x3b7   : > { %v1071_v62 = vmax.f32 %v1060_v8, 0.0  ;;  %v1070_v48 = vmax.f32 %v1059_v47, 0.0 }
 0x3b9   : > { %v1077_v53 = vpack.c.bf16 %v1071_v62, %v1070_v48 }
 0x3bb   : > { %2761 = vmatmul.mubr.msk.bf16.gmra.mxu1 %vm777_vm3, %v1077_v53  ;;  %2767 = vmatmul.mubr.msk.bf16.gmra.mxu0 %vm777_vm3, %v1077_v53 }
 0x3bc   : > { %1218 = vmatprep.mubr.bf16.mxu1 %v4417_v35  ;;  %1304 = vmatprep.mubr.bf16.mxu0 %v4417_v35 }
 0x3c3   : > { %2762 = vmatmul.mubr.msk.bf16.gmra.mxu1 %vm777_vm3, %v1078_v59  ;;  %2768 = vmatmul.mubr.msk.bf16.gmra.mxu0 %vm777_vm3, %v1078_v59 }
 0x3c4   : > { %2274 = vmatprep.mubr.bf16.mxu1 %v4417_v35  ;;  %2345 = vmatprep.mubr.bf16.mxu0 %v4417_v35 }
 0x44f   : > { %v3359_v61 = vpop.f32.mrf.mxu1  ;;  %v1261_v33 = vpop.f32.mrf.mxu0 }
 0x450   : > { %4452 = vst [vmem:[#allocation5_spill] sm:$0xff] %v3359_v61  ;;  %v1324_v6 = vrot.slane %v3359_v61, 1  ;;  %v1386_v9 = vrot.slane %v3359_v61, 2  ;;  %v1452_v5 = vrot.slane %v3359_v61, 3 }
 0x451   : > { %v1173_v63 = vpop.f32.mrf.mxu1  ;;  %v1262_v54 = vpop.f32.mrf.mxu0 }
 0x453   : > { %v3361_v19 = vpop.f32.mrf.mxu1  ;;  %v1263_v2 = vpop.f32.mrf.mxu0 }
 0x454   : > { %4453 = vst [vmem:[#allocation6_spill] sm:$0xff] %v3361_v19  ;;  %v1325_v3 = vrot.slane %v3361_v19, 1  ;;  %v1387_v4 = vrot.slane %v3361_v19, 2  ;;  %v1453_v26 = vrot.slane %v3361_v19, 3 }
 0x455   : > { %v1264_v10 = vpop.f32.mrf.mxu0  ;;  %v1176_v12 = vpop.f32.mrf.mxu1 }
 0x456   : > { %v1388_v7 = vsel %vm669_vm2, %v1386_v9, %v1387_v4  ;;  %v1326_v11 = vsel %vm561_vm1, %v1324_v6, %v1325_v3  ;;  %v1454_v60 = vsel %vm1451_vm4, %v1452_v5, %v1453_v26  ;;  %v1566_v27 = vrot.slane %v1176_v12, 2  ;;  %v2935_v6 = vld [vmem:[%s4414_s3 + $0x64] ss:$16 sps:$4 sm:$0xff]  }
 0x457   : > { %1410 = vrot.lane.b32.xlu1 %v1388_v7, %s2968_s6  ;;  %1345 = vrot.lane.b32.xlu0 %v1326_v11, %s2967_s30  ;;  %v1626_v34 = vrot.slane %v1176_v12, 3  ;;  %v1527_v36 = vrot.slane %v1176_v12, 1  ;;  %v1687_v8 = vrot.slane %v1176_v12, 4 }
 0x458   : > { %2254 = vmatprep.subr.bf16.mxu1 %v2935_v6 }
 0x45b   : > { %v3374_v13 = vpop.f32.mrf.mxu1  ;;  %v3376_v14 = vpop.f32.mrf.mxu0  ;;  %1476 = vrot.lane.b32.xlu1 %v1454_v60, %s2969_s9 }
 0x45c   : > { %4454 = vst [vmem:[#allocation7_spill] sm:$0xff] %v3374_v13  ;;  %v1327_v15 = vrot.slane %v3374_v13, 1  ;;  %v1389_v16 = vrot.slane %v3374_v13, 2  ;;  %v1455_v20 = vrot.slane %v3374_v13, 3  ;;  %v1756_v1 = vrot.slane %v3376_v14, 2 }
 0x45d   : > { %v1182_v44 = vpop.f32.mrf.mxu1  ;;  %v1269_v17 = vpop.f32.mrf.mxu0  ;;  %v1793_v9 = vrot.slane %v3376_v14, 3 }
 0x45e   : > { %v1567_v21 = vrot.slane %v1182_v44, 2  ;;  %v1390_v22 = vsel %vm669_vm2, %v1387_v4, %v1389_v16  ;;  %v1328_v23 = vsel %vm561_vm1, %v1325_v3, %v1327_v15  ;;  %v1528_v28 = vrot.slane %v1182_v44, 1  ;;  %v2933_v4 = vld [vmem:[%s4414_s3 + $0x60] ss:$16 sps:$4 sm:$0xff]  }
 0x45f   : > { %v3386_v24 = vpop.f32.mrf.mxu1  ;;  %v3388_v25 = vpop.f32.mrf.mxu0  ;;  %1412 = vrot.lane.b32.xlu0 %v1390_v22, %s2968_s6  ;;  %1347 = vrot.lane.b32.xlu1 %v1328_v23, %s2967_s30  ;;  %v1627_v29 = vrot.slane %v1182_v44, 3  ;;  %v1456_v37 = vsel %vm1451_vm4, %v1453_v26, %v1455_v20  ;;  %v1688_v18 = vrot.slane %v1182_v44, 4 }
 0x460   : > { %4455 = vst [vmem:[#allocation8_spill] sm:$0xff] %v3386_v24  ;;  %v4422_v30 = vrot.slane %v3388_v25, 2  ;;  %v1568_v32 = vsel %vm669_vm2, %v1566_v27, %v1567_v21  ;;  %v3416_v46 = vsel %vm561_vm1, %v1527_v36, %v1528_v28  ;;  %v1329_v48 = vrot.slane %v3386_v24, 1  ;;  %2255 = vmatpush1.bf16.msra.mxu1 %v2933_v4 }
 0x461   : > { %v3392_v51 = vpop.f32.mrf.mxu1  ;;  %v3404_v39 = vpop.f32.mrf.mxu0  ;;  %v1628_v49 = vsel %vm1451_vm4, %v1626_v34, %v1627_v29  ;;  %4456 = vst [vmem:[#allocation9_spill] sm:$0xff] %v3416_v46  ;;  %v1689_v55 = vsel %vm1686_vm5, %v1687_v8, %v1688_v18  ;;  %v1794_v63 = vrot.slane %v3388_v25, 3  ;;  %v1391_v7 = vrot.slane %v3386_v24, 2 }
 0x462   : > { %v4421_v31 = vrot.slane %v3392_v51, 1  ;;  %v1569_v41 = vrot.slane %v3392_v51, 2  ;;  %v1629_v40 = vrot.slane %v3392_v51, 3  ;;  %v3426_v0 = vsel %vm669_vm2, %v1756_v1, %v4422_v30  ;;  %v2936_v1 = vld [vmem:[%s4414_s3 + $0x68] ss:$16 sps:$4 sm:$0xff]  }
 0x463   : > { %1478 = vrot.lane.b32.xlu0 %v1456_v37, %s2969_s9  ;;  %1588 = vrot.lane.b32.xlu1 %v1568_v32, %s2967_s30  ;;  %4458 = vst [vmem:[#allocation11_spill] sm:$0xff] %v3426_v0  ;;  %v1690_v53 = vrot.slane %v3392_v51, 4  ;;  %v1330_v2 = vsel %vm561_vm1, %v1327_v15, %v1329_v48  ;;  %v1795_v5 = vsel %vm1451_vm4, %v1793_v9, %v1794_v63  ;;  %v1905_v37 = vrot.slane %v3388_v25, 5 }
 0x464   : > { %v1570_v42 = vsel %vm669_vm2, %v1567_v21, %v1569_v41  ;;  %v3421_v56 = vsel %vm561_vm1, %v1528_v28, %v4421_v31  ;;  %v1630_v58 = vsel %vm1451_vm4, %v1627_v29, %v1629_v40  ;;  %v1849_v21 = vrot.slane %v3388_v25, 4 }
 0x465   : > { %4457 = vst [vmem:[#allocation10_spill] sm:$0xff] %v3421_v56  ;;  %v1691_v3 = vsel %vm1686_vm5, %v1688_v18, %v1690_v53  ;;  %v1392_v23 = vsel %vm669_vm2, %v1389_v16, %v1391_v7  ;;  %v1457_v32 = vrot.slane %v3386_v24, 3  ;;  %v1848_v34 = vrot.slane %v3376_v14, 4  ;;  %v2938_v18 = vld [vmem:[%s4414_s3 + $0x6c] ss:$16 sps:$4 sm:$0xff]  }
 0x466   : > { %v2001_v8 = vrot.slane %v3404_v39, 4  ;;  %2325 = vmatprep.subr.bf16.mxu0 %v2938_v18 }
 0x467   : > { %v3411_v43 = vpop.f32.mrf.mxu1  ;;  %v3413_v45 = vpop.f32.mrf.mxu0  ;;  %1648 = vrot.lane.b32.xlu1 %v1628_v49, %s2968_s6  ;;  %1590 = vrot.lane.b32.xlu0 %v1570_v42, %s2967_s30  ;;  %v1904_v49 = vrot.slane %v3376_v14, 5  ;;  %v1458_v9 = vsel %vm1451_vm4, %v1455_v20, %v1457_v32 }
 0x468   : > { %v4420_v54 = vrot.slane %v3411_v43, 1  ;;  %v4426_v11 = vrot.slane %v3413_v45, 3  ;;  %v4419_v22 = vrot.slane %v3411_v43, 2  ;;  %v4429_v4 = vrot.slane %v3411_v43, 3  ;;  %2326 = vmatpush1.bf16.msra.mxu0 %v2936_v1 }
 0x469   : > { %v3430_v47 = vpop.f32.mrf.mxu1  ;;  %v3432_v62 = vpop.f32.mrf.mxu0 }
 0x46a   : > { %v1332_v12 = vsel %vm561_vm1, %v1329_v48, %v4420_v54  ;;  %v1797_v27 = vsel %vm1451_vm4, %v1794_v63, %v4426_v11  ;;  %v2051_v48 = vrot.slane %v3404_v39, 5  ;;  %v1850_v63 = vsel %vm1686_vm5, %v1848_v34, %v1849_v21 }
 0x46b   : > { %1709 = vrot.lane.b32.xlu1 %v1689_v55, %s2969_s9  ;;  %1650 = vrot.lane.b32.xlu0 %v1630_v58, %s2968_s6  ;;  %v3442_v59 = vpop.f32.mrf.mxu1  ;;  %v3444_v33 = vpop.f32.mrf.mxu0  ;;  %v4425_v58 = vrot.slane %v3413_v45, 4  ;;  %v2002_v20 = vrot.slane %v3432_v62, 4  ;;  %v4433_v35 = vrot.slane %v3432_v62, 6 }
 0x46d   : > { %v3461_v10 = vpop.f32.mrf.mxu1  ;;  %v3463_v26 = vpop.f32.mrf.mxu0  ;;  %v1852_v42 = vsel %vm1686_vm5, %v1849_v21, %v4425_v58  ;;  %v2003_v38 = vsel %vm1686_vm5, %v2001_v8, %v2002_v20 }
 0x46e   : > { %v4431_v54 = vrot.slane %v3463_v26, 4  ;;  %v4428_v30 = vrot.slane %v3461_v10, 3  ;;  %v4430_v6 = vrot.slane %v3463_v26, 5  ;;  %v4469_v56 = vrot.slane %v3461_v10, 4 }
 0x46f   : > { %1349 = vrot.lane.b32.xlu1 %v1330_v2, %s2967_s30  ;;  %1711 = vrot.lane.b32.xlu0 %v1691_v3, %s2969_s9  ;;  %v1394_v2 = vsel %vm669_vm2, %v1391_v7, %v4419_v22  ;;  %v4432_v7 = vrot.slane %v3413_v45, 5  ;;  %v4427_v22 = vrot.slane %v3461_v10, 2 }
 0x473   : > { %v3471_v60 = vpop.f32.mrf.mxu1  ;;  %v3473_v15 = vpop.f32.mrf.mxu0  ;;  %1813 = vrot.lane.b32.xlu1 %v1795_v5, %s2967_s30  ;;  %1351 = vrot.lane.b32.xlu0 %v1332_v12, %s2967_s30  ;;  %v1906_v5 = vsel %vm1903_vm6, %v1904_v49, %v1905_v37  ;;  %v2052_v49 = vrot.slane %v3432_v62, 5  ;;  %v1460_v12 = vsel %vm1451_vm4, %v1457_v32, %v4429_v4  ;;  %v2939_v4 = vld [vmem:[%s4414_s3 + $0x40] ss:$16 sps:$4 sm:$0xff]  }
 0x474   : > { %v4471_v46 = vrot.slane %v3473_v15, 5  ;;  %v4474_v61 = vrot.slane %v3473_v15, 4 }
 0x475   : > { %v3477_v44 = vpop.f32.mrf.mxu1  ;;  %v3479_v17 = vpop.f32.mrf.mxu0 }
 0x477   : > { %v3489_v28 = vpop.f32.mrf.mxu1  ;;  %v3491_v29 = vpop.f32.mrf.mxu0  ;;  %1414 = vrot.lane.b32.xlu1 %v1392_v23, %s2968_s6  ;;  %1815 = vrot.lane.b32.xlu0 %v1797_v27, %s2967_s30  ;;  %v1571_v23 = vrot.slane %v3430_v47, 2  ;;  %v1631_v27 = vrot.slane %v3430_v47, 3 }
 0x479   : > { %v3498_v36 = vpop.f32.mrf.mxu1  ;;  %v3500_v16 = vpop.f32.mrf.mxu0  ;;  %v1574_v58 = vsel %vm669_vm2, %v1571_v23, %v4427_v22  ;;  %v3586_v32 = vsel %vm1451_vm4, %v1629_v40, %v1631_v27 }
 0x47b   : > { %v3518_v3 = vpop.f32.mrf.mxu1  ;;  %v3520_v14 = vpop.f32.mrf.mxu0  ;;  %1868 = vrot.lane.b32.xlu1 %v1850_v63, %s2968_s6  ;;  %1416 = vrot.lane.b32.xlu0 %v1394_v2, %s2968_s6  ;;  %v1692_v63 = vrot.slane %v3430_v47, 4 }
 0x47c   : > { %4459 = vst [vmem:[#allocation12_spill] sm:$0xff] %v3518_v3  ;;  %v1859_v24 = vrot.slane %v3520_v14, 4  ;;  %v1915_v13 = vrot.slane %v3520_v14, 5 }
 0x47d   : > { %v3534_v34 = vpop.f32.mrf.mxu1  ;;  %v3536_v18 = vpop.f32.mrf.mxu0  ;;  %v3607_v40 = vsel %vm1686_vm5, %v1690_v53, %v1692_v63  ;;  %v4462_v53 = vrot.slane %v3404_v39, 6 }
 0x47e   : > { %v1639_v57 = vrot.slane %v3534_v34, 3  ;;  %v1700_v52 = vrot.slane %v3534_v34, 4 }
 0x47f   : > { %v3548_v31 = vpop.f32.mrf.mxu1  ;;  %v3550_v1 = vpop.f32.mrf.mxu0  ;;  %1480 = vrot.lane.b32.xlu1 %v1458_v9, %s2969_s9  ;;  %1870 = vrot.lane.b32.xlu0 %v1852_v42, %s2968_s6  ;;  %v1908_v42 = vsel %vm1903_vm6, %v1905_v37, %v4432_v7  ;;  %v1572_v9 = vsel %vm669_vm2, %v1569_v41, %v1571_v23  ;;  %v3591_v37 = vsel %vm1686_vm5, %v2002_v20, %v4431_v54  ;;  %v4463_v54 = vrot.slane %v3461_v10, 4 }
 0x480   : > { %4460 = vst [vmem:[#allocation13_spill] sm:$0xff] %v3548_v31  ;;  %v3594_v41 = vsel %vm1903_vm6, %v2051_v48, %v2052_v49  ;;  %v3602_v23 = vsel %vm1451_vm4, %v1631_v27, %v4428_v30  ;;  %v3612_v48 = vsel %vm1903_vm6, %v2052_v49, %v4430_v6  ;;  %v3626_v30 = vsel %vm2101_vm7, %v4462_v53, %v4433_v35 }
 0x481   : > { %v3562_v55 = vpop.f32.mrf.mxu1  ;;  %v3564_v2 = vpop.f32.mrf.mxu0  ;;  %v3634_v7 = vsel %vm1686_vm5, %v1692_v63, %v4463_v54  ;;  %v1696_v20 = vrot.slane %v3477_v44, 4  ;;  %v1857_v49 = vrot.slane %v3491_v29, 4  ;;  %v1913_v54 = vrot.slane %v3491_v29, 5 }
 0x482   : > { %v4464_v63 = vrot.slane %v3444_v33, 3  ;;  %v4465_v53 = vrot.slane %v3413_v45, 3  ;;  %v1577_v6 = vrot.slane %v3498_v36, 2  ;;  %v4468_v31 = vmov 0.0  }
 0x483   : > { %v3576_v21 = vpop.f32.mrf.mxu1  ;;  %v3578_v11 = vpop.f32.mrf.mxu0  ;;  %1924 = vrot.lane.b32.xlu1 %v1906_v5, %s2969_s9  ;;  %1482 = vrot.lane.b32.xlu0 %v1460_v12, %s2969_s9  ;;  %v1637_v5 = vrot.slane %v3498_v36, 3  ;;  %v1804_v12 = vrot.slane %v3520_v14, 3  ;;  %v3699_v3 = vsel %vm1903_vm6, %v4471_v46, %v1913_v54  ;;  %v3709_v0 = vsel %vm1686_vm5, %v4474_v61, %v1857_v49 }
 0x484   : > { %4461 = vst [vmem:[#allocation14_spill] sm:$0xff] %v3576_v21  ;;  %v4467_v21 = vrot.slane %v3432_v62, 6  ;;  %4475 = vst [vmem:[#allocation17_spill] sm:$0xff] %v3709_v0  ;;  %v4476_v46 = vrot.slane %v3477_v44, 3  ;;  %v2012_v61 = vrot.slane %v3564_v2, 4  ;;  %v4484_v0 = vrot.slane %v3388_v25, 2 }
 0x485   : > { %v3617_v22 = vpop.f32.mrf.mxu1  ;;  %v3619_v27 = vpop.f32.mrf.mxu0  ;;  %v2942_v25 = vld [vmem:[%s4414_s3 + $0x48] ss:$16 sps:$4 sm:$0xff]  }
 0x487   : > { %v1224_v35 = vpop.f32.mrf.mxu1  ;;  %v1310_v8 = vpop.f32.mrf.mxu0  ;;  %1926 = vrot.lane.b32.xlu0 %v1908_v42, %s2969_s9  ;;  %1592 = vrot.lane.b32.xlu1 %v1572_v9, %s2967_s30  ;;  %v1698_v42 = vrot.slane %v3498_v36, 4 }
 0x488   : > { %v3653_v35 = vsel %vm1451_vm4, %v4465_v53, %v4464_v63  ;;  %v2941_v8 = vld [vmem:[%s4414_s3 + $0x44] ss:$16 sps:$4 sm:$0xff]   ;;  %v2111_v53 = vrot.slane %v3536_v18, 6 }
 0x489   : > { %v1225_v9 = vpop.f32.mrf.mxu1  ;;  %v1311_v50 = vpop.f32.mrf.mxu0  ;;  %2256 = vmatprep.subr.bf16.mxu1 %v2941_v8  ;;  %v4466_v8 = vrot.slane %v3463_v26, 6 }
 0x48a   : > { %2257 = vmatpush1.bf16.msra.mxu1 %v2939_v4  ;;  %v1579_v9 = vrot.slane %v3534_v34, 2  ;;  %v2010_v4 = vrot.slane %v3536_v18, 4  ;;  %v2060_v50 = vrot.slane %v3536_v18, 5 }
 0x48b   : > { %2019 = vrot.lane.b32.xlu1 %v2003_v38, %s2967_s30  ;;  %1594 = vrot.lane.b32.xlu0 %v1574_v58, %s2967_s30  ;;  %v3680_v63 = vsel %vm2101_vm7, %v4467_v21, %v4466_v8  ;;  %v1806_v38 = vrot.slane %v3550_v1, 3  ;;  %v1861_v58 = vrot.slane %v3550_v1, 4  ;;  %v3693_v21 = vsel %vm1686_vm5, %v4469_v56, %v1696_v20 }
 0x48c   : > { %2875 = vmatprep.subr.bf16.mxu1 %v4468_v31  ;;  %4470 = vst [vmem:[#allocation15_spill] sm:$0xff] %v3693_v21  ;;  %v4472_v31 = vrot.slane %v3477_v44, 2  ;;  %v1641_v56 = vrot.slane %v3562_v55, 3  ;;  %v3723_v8 = vsel %vm1686_vm5, %v1696_v20, %v1698_v42  ;;  %v4479_v21 = vrot.slane %v3491_v29, 3 }
 0x48d   : > { %4478 = vst [vmem:[#allocation19_spill] sm:$0xff] %v3723_v8  ;;  %v3740_v20 = vsel %vm669_vm2, %v1577_v6, %v1579_v9  ;;  %v4483_v8 = vrot.slane %v3413_v45, 2 }
 0x48e   : > { %v3704_v19 = vsel %vm669_vm2, %v4472_v31, %v1577_v6  ;;  %v3720_v31 = vsel %vm1451_vm4, %v4476_v46, %v1637_v5  ;;  %v3737_v46 = vsel %vm1903_vm6, %v1913_v54, %v1915_v13  ;;  %4482 = vst [vmem:[#allocation22_spill] sm:$0xff] %v3740_v20  ;;  %v4490_v6 = vrot.slane %v3500_v16, 4 }
 0x48f   : > { %4473 = vst [vmem:[#allocation16_spill] sm:$0xff] %v3704_v19  ;;  %1652 = vrot.lane.b32.xlu1 %v3586_v32, %s2968_s6  ;;  %2021 = vrot.lane.b32.xlu0 %v3591_v37, %s2967_s30  ;;  %4477 = vst [vmem:[#allocation18_spill] sm:$0xff] %v3720_v31  ;;  %v3730_v19 = vsel %vm1451_vm4, %v4479_v21, %v1804_v12  ;;  %v3733_v32 = vsel %vm1686_vm5, %v1857_v49, %v1859_v24  ;;  %v2113_v37 = vrot.slane %v3564_v2, 6 }
 0x490   : > { %4480 = vst [vmem:[#allocation20_spill] sm:$0xff] %v3733_v32  ;;  %4481 = vst [vmem:[#allocation21_spill] sm:$0xff] %v3737_v46  ;;  %v3747_v31 = vsel %vm669_vm2, %v4484_v0, %v4483_v8  ;;  %v3750_v21 = vsel %vm1686_vm5, %v1698_v42, %v1700_v52  ;;  %v3753_v49 = vsel %vm1451_vm4, %v1637_v5, %v1639_v57  ;;  %v4488_v32 = vrot.slane %v3500_v16, 5  ;;  %v2944_v0 = vld [vmem:[%s4414_s3 + $0x4c] ss:$16 sps:$4 sm:$0xff]  }
 0x491   : > { %4485 = vst [vmem:[#allocation23_spill] sm:$0xff] %v3747_v31  ;;  %4486 = vst [vmem:[#allocation24_spill] sm:$0xff] %v3750_v21  ;;  %v3763_v20 = vsel %vm1686_vm5, %v4490_v6, %v2010_v4  ;;  %v1808_v5 = vrot.slane %v3578_v11, 3  ;;  %v1863_v42 = vrot.slane %v3578_v11, 4  ;;  %v1919_v8 = vrot.slane %v3578_v11, 5  ;;  %2327 = vmatprep.subr.bf16.mxu0 %v2944_v0 }
 0x492   : > { %4487 = vst [vmem:[#allocation25_spill] sm:$0xff] %v3753_v49  ;;  %v3758_v54 = vsel %vm1903_vm6, %v4488_v32, %v2060_v50  ;;  %4491 = vst [vmem:[#allocation27_spill] sm:$0xff] %v3763_v20  ;;  %v4492_v32 = vrot.slane %v3500_v16, 6  ;;  %v1643_v20 = vrot.slane %v3617_v22, 3  ;;  %v4495_v49 = vrot.slane %v3392_v51, 1  ;;  %2328 = vmatpush1.bf16.msra.mxu0 %v2942_v25 }
 0x493   : > { %4489 = vst [vmem:[#allocation26_spill] sm:$0xff] %v3758_v54  ;;  %2069 = vrot.lane.b32.xlu1 %v3594_v41, %s2968_s6  ;;  %1654 = vrot.lane.b32.xlu0 %v3602_v23, %s2968_s6  ;;  %v4494_v54 = vrot.slane %v3430_v47, 1  ;;  %v3792_v46 = vsel %vm1686_vm5, %v1859_v24, %v1861_v58  ;;  %v3795_v41 = vsel %vm1451_vm4, %v1804_v12, %v1806_v38  ;;  %v4496_v23 = vrot.slane %v3461_v10, 1 }
 0x494   : > { %v3781_v6 = vsel %vm2101_vm7, %v4492_v32, %v2111_v53  ;;  %v4498_v31 = vrot.slane %v3432_v62, 3  ;;  %v4499_v51 = vrot.slane %v3404_v39, 3  ;;  %v4500_v24 = vrot.slane %v3550_v1, 5 }
 0x495   : > { %4493 = vst [vmem:[#allocation28_spill] sm:$0xff] %v3781_v6  ;;  %v3789_v21 = vsel %vm561_vm1, %v4495_v49, %v4494_v54  ;;  %v4497_v32 = vmov %v4494_v54  ;;  %v3817_v54 = vsel %vm1451_vm4, %v1639_v57, %v1641_v56  ;;  %v4501_v47 = vrot.slane %v3463_v26, 3 }
 0x496   : > { %v3802_v6 = vsel %vm561_vm1, %v4497_v32, %v4496_v23  ;;  %v3809_v49 = vsel %vm1451_vm4, %v4499_v51, %v4498_v31  ;;  %v3814_v12 = vsel %vm1903_vm6, %v1915_v13, %v4500_v24  ;;  %v4502_v0 = vmov %v4498_v31 }
 0x497   : > { %v3824_v23 = vsel %vm1451_vm4, %v4502_v0, %v4501_v47  ;;  %v4503_v39 = vrot.slane %v3562_v55, 4  ;;  %v4504_v32 = vrot.slane %v3562_v55, 2  ;;  %v4505_v57 = vrot.slane %v3564_v2, 5  ;;  %1713 = vrot.lane.b32.xlu1 %v3607_v40, %s2969_s9  ;;  %2071 = vrot.lane.b32.xlu0 %v3612_v48, %s2968_s6 }
 0x498   : > { %v1583_v62 = vrot.slane %v3617_v22, 2  ;;  %v1704_v51 = vrot.slane %v3617_v22, 4  ;;  %v1976_v24 = vrot.slane %v3536_v18, 3  ;;  %v4507_v47 = vrot.slane %v3444_v33, 2 }
 0x499   : > { %v3829_v31 = vsel %vm1686_vm5, %v1700_v52, %v4503_v39  ;;  %v3834_v13 = vsel %vm669_vm2, %v1579_v9, %v4504_v32  ;;  %v3839_v25 = vsel %vm1903_vm6, %v2060_v50, %v4505_v57  ;;  %v3848_v52 = vsel %vm1686_vm5, %v2010_v4, %v2012_v61 }
 0x49a   : > { %v3851_v9 = vsel %vm2101_vm7, %v2111_v53, %v2113_v37  ;;  %v2014_v50 = vrot.slane %v3619_v27, 4  ;;  %v4508_v0 = vrot.slane %v3413_v45, 2  ;;  %v3863_v40 = vsel %vm1451_vm4, %v1806_v38, %v1808_v5 }
 0x49b   : > { %4506 = vst [vmem:[#allocation29_spill] sm:$0xff] %v3851_v9  ;;  %4509 = vst [vmem:[#allocation30_spill] sm:$0xff] %v3863_v40  ;;  %v1769_v48 = vrot.slane %v3550_v1, 2  ;;  %v2064_v4 = vrot.slane %v3619_v27, 5  ;;  %v2115_v53 = vrot.slane %v3619_v27, 6  ;;  %v3869_v18 = vsel %vm1686_vm5, %v1861_v58, %v1863_v42  ;;  %2120 = vrot.lane.b32.xlu1 %v3626_v30, %s2969_s9  ;;  %1715 = vrot.lane.b32.xlu0 %v3634_v7, %s2969_s9 }
 0x49c   : > { %v3860_v39 = vsel %vm669_vm2, %v4508_v0, %v4507_v47  ;;  %v1542_v32 = vrot.slane %v3562_v55, 1  ;;  %v4510_v57 = vrot.slane %v3473_v15, 2  ;;  %v4511_v9 = vmov %v4507_v47 }
 0x49d   : > { %v4512_v38 = vrot.slane %v3550_v1, 5  ;;  %v3883_v0 = vsel %vm1451_vm4, %v1641_v56, %v1643_v20  ;;  %v1978_v40 = vrot.slane %v3564_v2, 3  ;;  %v4513_v42 = vrot.slane %v3562_v55, 2 }
 0x49e   : > { %v3877_v47 = vsel %vm669_vm2, %v4511_v9, %v4510_v57  ;;  %v1771_v20 = vrot.slane %v3578_v11, 2  ;;  %v1544_v30 = vrot.slane %v3617_v22, 1  ;;  %v4515_v9 = vrot.slane %v3479_v17, 3 }
 0x49f   : > { %v1920_v5 = vsel %vm1903_vm6, %v4512_v38, %v1919_v8  ;;  %v3896_v1 = vsel %vm669_vm2, %v4513_v42, %v1583_v62  ;;  %v4514_v8 = vrot.slane %v3562_v55, 4  ;;  %v4516_v7 = vrot.slane %v3463_v26, 3  ;;  %1817 = vrot.lane.b32.xlu1 %v3653_v35, %s2967_s30  ;;  %2122 = vrot.lane.b32.xlu0 %v3680_v63, %s2969_s9 }
 0x4a0   : > { %v3891_v58 = vsel %vm1686_vm5, %v1920_v5, 0.0  ;;  %v3913_v38 = vsel %vm1686_vm5, %v2012_v61, %v2014_v50  ;;  %v1980_v62 = vrot.slane %v3619_v27, 3  ;;  %v4517_v55 = vrot.slane %v3564_v2, 5 }
 0x4a1   : > { %v3901_v56 = vsel %vm1686_vm5, %v4514_v8, %v1704_v51  ;;  %v3910_v57 = vsel %vm1451_vm4, %v4516_v7, %v4515_v9  ;;  %v4518_v11 = vrot.slane %v3500_v16, 3  ;;  %v4519_v22 = vmov %v4515_v9 }
 0x4a2   : > { %v2065_v51 = vsel %vm1903_vm6, %v4517_v55, %v2064_v4  ;;  %v2116_v42 = vsel %vm2101_vm7, %v2113_v37, %v2115_v53  ;;  %v4520_v27 = vrot.slane %v3477_v44, 1  ;;  %v4521_v2 = vrot.slane %v3461_v10, 1 }
 0x4a3   : > { %v3924_v5 = vsel %vm1451_vm4, %v4519_v22, %v4518_v11  ;;  %v3928_v8 = vsel %vm1686_vm5, %v2065_v51, 0.0  ;;  %v3931_v61 = vsel %vm1903_vm6, %v2116_v42, 0.0  ;;  %v4522_v4 = vrot.slane %v3491_v29, 2 }
 0x4a4   : > { %v3938_v50 = vsel %vm561_vm1, %v4521_v2, %v4520_v27  ;;  %v4523_v9 = vrot.slane %v3473_v15, 2  ;;  %v4524_v37 = vrot.slane %v3498_v36, 1  ;;  %v4525_v53 = vmov %v4520_v27 }
 0x4a5   : > { %v4526_v51 = vrot.slane %v3520_v14, 2  ;;  %v4527_v11 = vmov %v4522_v4  ;;  %v4528_v42 = vrot.slane %v3534_v34, 1  ;;  %v4530_v27 = vrot.slane %v3500_v16, 3 }
 0x4a6   : > { %v3945_v7 = vsel %vm669_vm2, %v4523_v9, %v4522_v4  ;;  %v3956_v55 = vsel %vm561_vm1, %v4525_v53, %v4524_v37  ;;  %v4529_v35 = vmov %v4524_v37  ;;  %v3988_v36 = vsel %vm1451_vm4, %v1976_v24, %v1978_v40 }
 0x4a7   : > { %v3963_v22 = vsel %vm669_vm2, %v4527_v11, %v4526_v51  ;;  %v3970_v63 = vsel %vm561_vm1, %v4529_v35, %v4528_v42  ;;  %v3975_v2 = vsel %vm1451_vm4, %v4530_v27, %v1976_v24  ;;  %v4531_v4 = vmov %v4526_v51 }
 0x4a8   : > { %v3980_v9 = vsel %vm669_vm2, %v4531_v4, %v1769_v48  ;;  %v4532_v37 = vmov %v4528_v42  ;;  %v3991_v51 = vsel %vm669_vm2, %v1769_v48, %v1771_v20  ;;  %v3994_v11 = vsel %vm561_vm1, %v1542_v32, %v1544_v30 }
 0x4a9   : > { %v3985_v53 = vsel %vm561_vm1, %v4532_v37, %v1542_v32  ;;  %4534 = vst [vmem:[#allocation32_spill] sm:$0xff] %v3991_v51  ;;  %4535 = vst [vmem:[#allocation33_spill] sm:$0xff] %v3994_v11  ;;  %v3997_v42 = vsel %vm1451_vm4, %v1978_v40, %v1980_v62  ;;  %v1909_v14 = vrot.slane %v3444_v33, 5  ;;  %v4537_v35 = vrot.slane %v3444_v33, 4 }
 0x4aa   : > { %4533 = vst [vmem:[#allocation31_spill] sm:$0xff] %v3985_v53  ;;  %4536 = vst [vmem:[#allocation34_spill] sm:$0xff] %v3997_v42  ;;  %v4538_v34 = vrot.slane %v3413_v45, 4  ;;  %v4539_v24 = vrot.slane %v3473_v15, 3  ;;  %v4540_v4 = vrot.slane %v3444_v33, 3  ;;  %v2006_v40 = vrot.slane %v3479_v17, 4 }
 0x4ab   : > { %v4541_v32 = vrot.slane %v3413_v45, 5  ;;  %v4542_v30 = vrot.slane %v3473_v15, 4  ;;  %v4543_v62 = vmov %v4537_v35  ;;  %v4545_v45 = vrot.slane %v3463_v26, 4 }
 0x4ac   : > { %v1854_v27 = vsel %vm1686_vm5, %v4538_v34, %v4537_v35  ;;  %v1801_v48 = vsel %vm1451_vm4, %v4540_v4, %v4539_v24  ;;  %v2056_v35 = vrot.slane %v3479_v17, 5  ;;  %v4544_v34 = vrot.slane %v3473_v15, 5 }
 0x4ad   : > { %1872 = vrot.lane.b32.xlu1 %v1854_v27, %s2968_s6  ;;  %1819 = vrot.lane.b32.xlu0 %v1801_v48, %s2967_s30  ;;  %v1910_v20 = vsel %vm1903_vm6, %v4541_v32, %v1909_v14  ;;  %v1856_v37 = vsel %vm1686_vm5, %v4543_v62, %v4542_v30  ;;  %v2007_v24 = vsel %vm1686_vm5, %v4545_v45, %v2006_v40  ;;  %v2107_v33 = vrot.slane %v3479_v17, 6 }
 0x4ae   : > { %v1912_v27 = vsel %vm1903_vm6, %v1909_v14, %v4544_v34  ;;  %v4546_v4 = vrot.slane %v3463_v26, 5  ;;  %v4547_v32 = vrot.slane %v3500_v16, 4  ;;  %v1333_v14 = vrot.slane %v3442_v59, 1 }
 0x4af   : > { %v4548_v30 = vrot.slane %v3463_v26, 6  ;;  %v4549_v17 = vrot.slane %v3500_v16, 5  ;;  %v1335_v34 = vrot.slane %v3471_v60, 1  ;;  %v4551_v26 = vrot.slane %v3500_v16, 6 }
 0x4b0   : > { %v2057_v48 = vsel %vm1903_vm6, %v4546_v4, %v2056_v35  ;;  %v1397_v4 = vrot.slane %v3471_v60, 2  ;;  %v1463_v16 = vrot.slane %v3471_v60, 3 }
 0x4b1   : > { %1928 = vrot.lane.b32.xlu1 %v1910_v20, %s2969_s9  ;;  %1874 = vrot.lane.b32.xlu0 %v1856_v37, %s2968_s6  ;;  %v2009_v20 = vsel %vm1686_vm5, %v2006_v40, %v4547_v32  ;;  %v2108_v62 = vsel %vm2101_vm7, %v4548_v30, %v2107_v33  ;;  %v2059_v37 = vsel %vm1903_vm6, %v2056_v35, %v4549_v17  ;;  %v1395_v40 = vrot.slane %v3442_v59, 2 }
 0x4b2   : > { %v1461_v35 = vrot.slane %v3442_v59, 3  ;;  %v4553_v30 = vrot.slane %v3411_v43, 3 }
 0x4b3   : > { %v1398_v17 = vsel %vm669_vm2, %v1395_v40, %v1397_v4 }
 0x4b5   : > { %1930 = vrot.lane.b32.xlu0 %v1912_v27, %s2969_s9  ;;  %2023 = vrot.lane.b32.xlu1 %v2007_v24, %s2967_s30  ;;  %v4550_v27 = vrot.slane %v3411_v43, 1  ;;  %v2110_v24 = vsel %vm2101_vm7, %v2107_v33, %v4551_v26  ;;  %v1337_v33 = vrot.slane %v3489_v28, 1  ;;  %v4554_v26 = vrot.slane %v3477_v44, 2 }
 0x4b7   : > { %v1334_v45 = vsel %vm561_vm1, %v4550_v27, %v1333_v14  ;;  %v1338_v27 = vsel %vm561_vm1, %v1335_v34, %v1337_v33 }
 0x4b9   : > { %2073 = vrot.lane.b32.xlu1 %v2057_v48, %s2968_s6  ;;  %2025 = vrot.lane.b32.xlu0 %v2009_v20, %s2967_s30  ;;  %v4552_v48 = vrot.slane %v3411_v43, 2  ;;  %v1336_v20 = vsel %vm561_vm1, %v1333_v14, %v1335_v34  ;;  %v1399_v14 = vrot.slane %v3489_v28, 2 }
 0x4bb   : > { %v1396_v32 = vsel %vm669_vm2, %v4552_v48, %v1395_v40  ;;  %v4555_v40 = vrot.slane %v3461_v10, 2  ;;  %v1400_v48 = vsel %vm669_vm2, %v1397_v4, %v1399_v14 }
 0x4bd   : > { %2124 = vrot.lane.b32.xlu1 %v2108_v62, %s2969_s9  ;;  %2075 = vrot.lane.b32.xlu0 %v2059_v37, %s2968_s6  ;;  %v1462_v62 = vsel %vm1451_vm4, %v4553_v30, %v1461_v35  ;;  %v1464_v37 = vsel %vm1451_vm4, %v1461_v35, %v1463_v16 }
 0x4c1   : > { %1353 = vrot.lane.b32.xlu1 %v1334_v45, %s2967_s30  ;;  %2126 = vrot.lane.b32.xlu0 %v2110_v24, %s2969_s9  ;;  %v1465_v45 = vrot.slane %v3489_v28, 3  ;;  %v1576_v24 = vsel %vm669_vm2, %v4555_v40, %v4554_v26  ;;  %v4560_v40 = vld [vmem:[#allocation6_spill] sm:$0xff] }
 0x4c5   : > { %1418 = vrot.lane.b32.xlu1 %v1396_v32, %s2968_s6  ;;  %1355 = vrot.lane.b32.xlu0 %v1336_v20, %s2967_s30  ;;  %v4556_v32 = vrot.slane %v3477_v44, 3  ;;  %v4557_v20 = vrot.slane %v3461_v10, 3 }
 0x4c7   : > { %v1636_v30 = vsel %vm1451_vm4, %v4557_v20, %v4556_v32 }
 0x4c9   : > { %1484 = vrot.lane.b32.xlu1 %v1462_v62, %s2969_s9  ;;  %1420 = vrot.lane.b32.xlu0 %v1398_v17, %s2968_s6  ;;  %v1346_v35 = vpop.permute.xlu0 %1345  ;;  %v1411_v34 = vpop.permute.xlu1 %1410  ;;  %v1466_v62 = vsel %vm1451_vm4, %v1463_v16, %v1465_v45  ;;  %v4558_v17 = vld [vmem:[#allocation5_spill] sm:$0xff]  ;;  %v4561_v16 = vrot.slane %v3491_v29, 3  ;;  %v4566_v29 = vld [vmem:[#allocation18_spill] sm:$0xff] }
 0x4ca   : > { %v1375_v4 = vadd.f32 %v1346_v35, %v4558_v17  ;;  %v4563_v35 = vld [vmem:[#allocation16_spill] sm:$0xff] }
 0x4cc   : > { %v1440_v44 = vadd.f32 %v1411_v34, %v1375_v4  ;;  %v4564_v34 = vld [vmem:[#allocation12_spill] sm:$0xff] }
 0x4cd   : > { %1486 = vrot.lane.b32.xlu0 %v1464_v37, %s2969_s9  ;;  %1357 = vrot.lane.b32.xlu1 %v1338_v27, %s2967_s30  ;;  %v1477_v37 = vpop.permute.xlu1 %1476  ;;  %v4559_v27 = vld [vmem:[#allocation15_spill] sm:$0xff]  ;;  %v1339_v17 = vrot.slane %v4564_v34, 1 }
 0x4ce   : > { %v1506_v20 = vadd.f32 %v1477_v37, %v1440_v44  ;;  %v4568_v37 = vld [vmem:[#allocation10_spill] sm:$0xff] }
 0x4d1   : > { %1596 = vrot.lane.b32.xlu0 %v1576_v24, %s2967_s30  ;;  %1422 = vrot.lane.b32.xlu1 %v1400_v48, %s2968_s6  ;;  %v1413_v26 = vpop.permute.xlu0 %1412  ;;  %v1348_v10 = vpop.permute.xlu1 %1347  ;;  %v4562_v48 = vrot.slane %v3473_v15, 3  ;;  %v4567_v15 = vld [vmem:[#allocation9_spill] sm:$0xff] }
 0x4d2   : > { %v1376_v24 = vadd.f32 %v1348_v10, %v4560_v40  ;;  %v1555_v10 = vadd.f32 %v4567_v15, %v1506_v20 }
 0x4d3   : > { %v1803_v32 = vsel %vm1451_vm4, %v4562_v48, %v4561_v16  ;;  %v1401_v48 = vrot.slane %v4564_v34, 2 }
 0x4d5   : > { %1656 = vrot.lane.b32.xlu0 %v1636_v30, %s2968_s6  ;;  %1488 = vrot.lane.b32.xlu1 %v1466_v62, %s2969_s9  ;;  %v1441_v30 = vadd.f32 %v1413_v26, %v1376_v24  ;;  %v1479_v62 = vpop.permute.xlu0 %1478  ;;  %v1340_v26 = vsel %vm561_vm1, %v1337_v33, %v1339_v17  ;;  %v4569_v24 = vld [vmem:[#allocation19_spill] sm:$0xff]  ;;  %v1402_v15 = vsel %vm669_vm2, %v1399_v14, %v1401_v48 }
 0x4d7   : > { %v1507_v4 = vadd.f32 %v1479_v62, %v1441_v30 }
 0x4d9   : > { %1717 = vrot.lane.b32.xlu0 %v4559_v27, %s2969_s9  ;;  %1932 = vrot.lane.b32.xlu1 %v3699_v3, %s2969_s9  ;;  %v1589_v3 = vpop.permute.xlu1 %1588  ;;  %v4565_v27 = vld [vmem:[#allocation17_spill] sm:$0xff]  ;;  %v1591_v40 = vpop.permute.xlu0 %1590  ;;  %v1556_v44 = vadd.f32 %v4568_v37, %v1507_v4 }
 0x4db   : > { %v1616_v20 = vadd.f32 %v1591_v40, %v1556_v44  ;;  %v4572_v40 = vld [vmem:[#allocation23_spill] sm:$0xff] }
 0x4dd   : > { %1821 = vrot.lane.b32.xlu0 %v1803_v32, %s2967_s30  ;;  %1598 = vrot.lane.b32.xlu1 %v4563_v35, %s2967_s30  ;;  %v1649_v16 = vpop.permute.xlu1 %1648  ;;  %v1615_v32 = vadd.f32 %v1589_v3, %v1555_v10  ;;  %v1651_v30 = vpop.permute.xlu0 %1650  ;;  %v4570_v3 = vld [vmem:[#allocation11_spill] sm:$0xff] }
 0x4de   : > { %v1676_v33 = vadd.f32 %v1651_v30, %v1616_v20  ;;  %v4575_v20 = vld [vmem:[#allocation24_spill] sm:$0xff] }
 0x4df   : > { %v1675_v35 = vadd.f32 %v1649_v16, %v1615_v32  ;;  %v4571_v32 = vld [vmem:[#allocation20_spill] sm:$0xff] }
 0x4e1   : > { %1876 = vrot.lane.b32.xlu0 %v4565_v27, %s2968_s6  ;;  %1658 = vrot.lane.b32.xlu1 %v4566_v29, %s2968_s6  ;;  %v1710_v62 = vpop.permute.xlu1 %1709  ;;  %v1467_v27 = vrot.slane %v4564_v34, 3  ;;  %v1712_v10 = vpop.permute.xlu0 %1711 }
 0x4e2   : > { %v1736_v29 = vadd.f32 %v1710_v62, %v1675_v35  ;;  %v4574_v35 = vld [vmem:[#allocation22_spill] sm:$0xff] }
 0x4e3   : > { %v1468_v16 = vsel %vm1451_vm4, %v1465_v45, %v1467_v27  ;;  %v4576_v45 = vld [vmem:[#allocation25_spill] sm:$0xff] }
 0x4e4   : > { %v1782_v4 = vadd.f32 %v4570_v3, %v1736_v29 }
 0x4e5   : > { %1719 = vrot.lane.b32.xlu1 %v4569_v24, %s2969_s9  ;;  %1359 = vrot.lane.b32.xlu0 %v1340_v26, %s2967_s30  ;;  %v1350_v37 = vpop.permute.xlu1 %1349  ;;  %v1737_v26 = vadd.f32 %v1712_v10, %v1676_v33  ;;  %v1352_v44 = vpop.permute.xlu0 %1351  ;;  %v4577_v33 = vld [vmem:[#allocation13_spill] sm:$0xff]  ;;  %v4578_v10 = vld [vmem:[#allocation26_spill] sm:$0xff] }
 0x4e6   : > { %v1341_v3 = vrot.slane %v4577_v33, 1 }
 0x4e7   : > { %v1783_v14 = vadd.f32 %v4572_v40, %v1737_v26  ;;  %v4579_v26 = vld [vmem:[#allocation27_spill] sm:$0xff]  ;;  %v1403_v40 = vrot.slane %v4577_v33, 2 }
 0x4e9   : > { %1823 = vrot.lane.b32.xlu1 %v3730_v19, %s2967_s30  ;;  %1424 = vrot.lane.b32.xlu0 %v1402_v15, %s2968_s6  ;;  %v1814_v24 = vpop.permute.xlu1 %1813  ;;  %v4573_v19 = vld [vmem:[#allocation21_spill] sm:$0xff]  ;;  %v1816_v30 = vpop.permute.xlu0 %1815  ;;  %v1404_v42 = vsel %vm669_vm2, %v1401_v48, %v1403_v40 }
 0x4ea   : > { %v1838_v51 = vadd.f32 %v1816_v30, %v1783_v14 }
 0x4ed   : > { %1878 = vrot.lane.b32.xlu1 %v4571_v32, %s2968_s6  ;;  %1490 = vrot.lane.b32.xlu0 %v1468_v16, %s2969_s9  ;;  %v1415_v62 = vpop.permute.xlu1 %1414  ;;  %v1417_v29 = vpop.permute.xlu0 %1416 }
 0x4f1   : > { %1934 = vrot.lane.b32.xlu0 %v4573_v19, %s2969_s9  ;;  %1600 = vrot.lane.b32.xlu1 %v4574_v35, %s2967_s30  ;;  %v1869_v15 = vpop.permute.xlu1 %1868  ;;  %v1871_v16 = vpop.permute.xlu0 %1870  ;;  %v1469_v19 = vrot.slane %v4577_v33, 3  ;;  %v1837_v35 = vadd.f32 %v1814_v24, %v1782_v4 }
 0x4f2   : > { %v1893_v4 = vadd.f32 %v1871_v16, %v1838_v51 }
 0x4f3   : > { %v1892_v11 = vadd.f32 %v1869_v15, %v1837_v35 }
 0x4f5   : > { %1721 = vrot.lane.b32.xlu0 %v4575_v20, %s2969_s9  ;;  %1660 = vrot.lane.b32.xlu1 %v4576_v45, %s2968_s6  ;;  %v1481_v32 = vpop.permute.xlu1 %1480  ;;  %v1342_v20 = vsel %vm561_vm1, %v1339_v17, %v1341_v3  ;;  %v4580_v45 = vld [vmem:[#allocation28_spill] sm:$0xff]  ;;  %v1483_v34 = vpop.permute.xlu0 %1482 }
 0x4f9   : > { %2077 = vrot.lane.b32.xlu0 %v4578_v10, %s2968_s6  ;;  %2027 = vrot.lane.b32.xlu1 %v4579_v26, %s2967_s30  ;;  %v1925_v10 = vpop.permute.xlu1 %1924  ;;  %v1470_v26 = vsel %vm1451_vm4, %v1467_v27, %v1469_v19  ;;  %v1927_v24 = vpop.permute.xlu0 %1926 }
 0x4fa   : > { %v1948_v53 = vadd.f32 %v1925_v10, %v1892_v11  ;;  %v1949_v33 = vadd.f32 %v1927_v24, %v1893_v4  ;;  %v4581_v11 = vld [vmem:[#allocation7_spill] sm:$0xff]  ;;  %v4584_v4 = vld [vmem:[#allocation29_spill] sm:$0xff] }
 0x4fb   : > { %v1377_v27 = vadd.f32 %v1350_v37, %v4581_v11  ;;  %v4583_v37 = vld [vmem:[#allocation14_spill] sm:$0xff] }
 0x4fc   : > { %v1990_v17 = vadd.f32 %v3809_v49, %v1948_v53  ;;  %v1991_v48 = vadd.f32 %v3824_v23, %v1949_v33  ;;  %v4582_v49 = vld [vmem:[#allocation8_spill] sm:$0xff] }
 0x4fd   : > { %2128 = vrot.lane.b32.xlu1 %v4580_v45, %s2969_s9  ;;  %1361 = vrot.lane.b32.xlu0 %v1342_v20, %s2967_s30  ;;  %v1593_v45 = vpop.permute.xlu1 %1592  ;;  %v1595_v14 = vpop.permute.xlu0 %1594  ;;  %v1442_v15 = vadd.f32 %v1415_v62, %v1377_v27  ;;  %v1378_v53 = vadd.f32 %v1352_v44, %v4582_v49 }
 0x4ff   : > { %v1508_v51 = vadd.f32 %v1481_v32, %v1442_v15  ;;  %v1443_v16 = vadd.f32 %v1417_v29, %v1378_v53  ;;  %v1471_v32 = vrot.slane %v4583_v37, 3 }
 0x501   : > { %1492 = vrot.lane.b32.xlu1 %v1470_v26, %s2969_s9  ;;  %1426 = vrot.lane.b32.xlu0 %v1404_v42, %s2968_s6  ;;  %v2020_v30 = vpop.permute.xlu1 %2019  ;;  %v1557_v23 = vadd.f32 %v3789_v21, %v1508_v51  ;;  %v4585_v51 = vld [vmem:[#allocation30_spill] sm:$0xff] }
 0x502   : > { %v2040_v20 = vadd.f32 %v2020_v30, %v1990_v17 }
 0x503   : > { %v1617_v44 = vadd.f32 %v1593_v45, %v1557_v23 }
 0x505   : > { %1880 = vrot.lane.b32.xlu1 %v3792_v46, %s2968_s6  ;;  %1825 = vrot.lane.b32.xlu0 %v3795_v41, %s2967_s30  ;;  %v2022_v46 = vpop.permute.xlu0 %2021  ;;  %v1653_v42 = vpop.permute.xlu1 %1652  ;;  %v1509_v41 = vadd.f32 %v1483_v34, %v1443_v16 }
 0x506   : > { %v2041_v27 = vadd.f32 %v2022_v46, %v1991_v48  ;;  %v1811_v46 = vsel %vm669_vm2, %v4585_v51, 0.0 }
 0x509   : > { %1936 = vrot.lane.b32.xlu0 %v3814_v12, %s2969_s9  ;;  %1662 = vrot.lane.b32.xlu1 %v3817_v54, %s2968_s6  ;;  %v1343_v12 = vrot.slane %v4583_v37, 1  ;;  %v1655_v62 = vpop.permute.xlu0 %1654  ;;  %v2070_v33 = vpop.permute.xlu1 %2069  ;;  %v1405_v54 = vrot.slane %v4583_v37, 2 }
 0x50a   : > { %v2090_v24 = vadd.f32 %v2070_v33, %v2040_v20  ;;  %v1646_v33 = vsel %vm669_vm2, %v3883_v0, 0.0  ;;  %v1707_v0 = vsel %vm1451_vm4, %v3901_v56, 0.0 }
 0x50b   : > { %v1344_v29 = vsel %vm561_vm1, %v1341_v3, %v1343_v12  ;;  %v1406_v26 = vsel %vm669_vm2, %v1403_v40, %v1405_v54 }
 0x50c   : > { %v1408_v3 = vsel %vm561_vm1, %v1406_v26, 0.0 }
 0x50d   : > { %1723 = vrot.lane.b32.xlu1 %v3829_v31, %s2969_s9  ;;  %1602 = vrot.lane.b32.xlu0 %v3834_v13, %s2967_s30  ;;  %v1558_v31 = vadd.f32 %v3802_v6, %v1509_v41  ;;  %v1677_v13 = vadd.f32 %v1653_v42, %v1617_v44  ;;  %v2072_v34 = vpop.permute.xlu0 %2071  ;;  %v1714_v21 = vpop.permute.xlu1 %1713  ;;  %v1866_v42 = vsel %vm1451_vm4, %v3869_v18, 0.0 }
 0x50e   : > { %v2091_v30 = vadd.f32 %v2072_v34, %v2041_v27  ;;  %v1586_v34 = vsel %vm561_vm1, %v3896_v1, 0.0  ;;  %v2017_v1 = vsel %vm1451_vm4, %v3913_v38, 0.0 }
 0x50f   : > { %v1618_v35 = vadd.f32 %v1595_v14, %v1558_v31  ;;  %v1738_v10 = vadd.f32 %v1714_v21, %v1677_v13 }
 0x511   : > { %2079 = vrot.lane.b32.xlu1 %v3839_v25, %s2968_s6  ;;  %2029 = vrot.lane.b32.xlu0 %v3848_v52, %s2967_s30  ;;  %v1472_v25 = vsel %vm1451_vm4, %v1469_v19, %v1471_v32  ;;  %v1678_v52 = vadd.f32 %v1655_v62, %v1618_v35  ;;  %v1784_v6 = vadd.f32 %v3860_v39, %v1738_v10  ;;  %v1716_v45 = vpop.permute.xlu0 %1715  ;;  %v2121_v11 = vpop.permute.xlu1 %2120  ;;  %v4198_v39 = vld [vmem:[%s4415_s4 + $0x3] ss:$0 sm:$0xff] }
 0x512   : > { %v2141_v14 = vadd.f32 %v2121_v11, %v2090_v24  ;;  %v1474_v40 = vsel %vm669_vm2, %v1472_v25, 0.0 }
 0x513   : > { %v1739_v17 = vadd.f32 %v1716_v45, %v1678_v52 }
 0x514   : > { %v2156_v48 = vadd.f32 %v4198_v39, %v2141_v14 }
 0x515   : > { %2130 = vrot.lane.b32.xlu0 %v4584_v4, %s2969_s9  ;;  %1363 = vrot.lane.b32.xlu1 %v1344_v29, %s2967_s30  ;;  %v1785_v19 = vadd.f32 %v3877_v47, %v1739_v17  ;;  %v2123_v15 = vpop.permute.xlu0 %2122  ;;  %v1818_v49 = vpop.permute.xlu1 %1817  ;;  %v4586_v29 = vmov 0  }
 0x516   : > { %v2142_v53 = vadd.f32 %v2123_v15, %v2091_v30  ;;  %v2167_v23 = vmax.f32 %v2156_v48, 0.0  ;;  %v1839_v62 = vadd.f32 %v1818_v49, %v1784_v6 }
 0x518   : > { %v2157_v47 = vadd.f32 %v4198_v39, %v2142_v53 }
 0x519   : > { %1428 = vrot.lane.b32.xlu0 %v1408_v3, %s2968_s6  ;;  %1494 = vrot.lane.b32.xlu1 %v1474_v40, %s2969_s9 }
 0x51a   : > { %v2168_v12 = vmax.f32 %v2157_v47, 0.0 }
 0x51c   : > { %v2178_v18 = vpack.c.bf16 %v2168_v12, %v2167_v23 }
 0x51d   : > { %1827 = vrot.lane.b32.xlu0 %v1811_v46, %s2967_s30  ;;  %1882 = vrot.lane.b32.xlu1 %v1866_v42, %s2968_s6 }
 0x51e   : > { %2778 = vmatmul.mubr.msk.bf16.vlgmr.msra.gmra.mxu1 %vm777_vm3, %v2178_v18  ;;  %2784 = vmatmul.mubr.msk.bf16.vlgmr.msra.gmra.mxu0 %vm777_vm3, %v2178_v18 }
 0x51f   : > { %v1820_v16 = vpop.permute.xlu0 %1819  ;;  %v1873_v41 = vpop.permute.xlu1 %1872  ;;  %2282 = vmatprep.mubr.bf16.mxu1 %v4586_v29  ;;  %2351 = vmatprep.mubr.bf16.mxu0 %v4586_v29 }
 0x520   : > { %v1894_v54 = vadd.f32 %v1873_v41, %v1839_v62  ;;  %v1840_v31 = vadd.f32 %v1820_v16, %v1785_v19 }
 0x521   : > { %1938 = vrot.lane.b32.xlu0 %v3891_v58, %s2969_s9  ;;  %1664 = vrot.lane.b32.xlu1 %v1646_v33, %s2968_s6 }
 0x523   : > { %v1875_v44 = vpop.permute.xlu0 %1874  ;;  %v1929_v32 = vpop.permute.xlu1 %1928 }
 0x524   : > { %v1950_v13 = vadd.f32 %v1929_v32, %v1894_v54  ;;  %v1895_v58 = vadd.f32 %v1875_v44, %v1840_v31 }
 0x525   : > { %1604 = vrot.lane.b32.xlu0 %v1586_v34, %s2967_s30  ;;  %1725 = vrot.lane.b32.xlu1 %v1707_v0, %s2969_s9 }
 0x526   : > { %v1992_v21 = vadd.f32 %v3910_v57, %v1950_v13 }
 0x527   : > { %v1931_v35 = vpop.permute.xlu0 %1930  ;;  %v2024_v20 = vpop.permute.xlu1 %2023 }
 0x528   : > { %v1951_v10 = vadd.f32 %v1931_v35, %v1895_v58  ;;  %v2042_v57 = vadd.f32 %v2024_v20, %v1992_v21 }
 0x529   : > { %2031 = vrot.lane.b32.xlu0 %v2017_v1, %s2967_s30  ;;  %2081 = vrot.lane.b32.xlu1 %v3928_v8, %s2968_s6 }
 0x52a   : > { %v1993_v56 = vadd.f32 %v3924_v5, %v1951_v10 }
 0x52b   : > { %v2026_v26 = vpop.permute.xlu0 %2025  ;;  %v2074_v4 = vpop.permute.xlu1 %2073 }
 0x52c   : > { %v2092_v25 = vadd.f32 %v2074_v4, %v2042_v57  ;;  %v2043_v6 = vadd.f32 %v2026_v26, %v1993_v56 }
 0x52d   : > { %2132 = vrot.lane.b32.xlu1 %v3931_v61, %s2969_s9 }
 0x52f   : > { %v2076_v52 = vpop.permute.xlu0 %2075  ;;  %v2125_v24 = vpop.permute.xlu1 %2124 }
 0x530   : > { %v2143_v45 = vadd.f32 %v2125_v24, %v2092_v25  ;;  %v2093_v11 = vadd.f32 %v2076_v52, %v2043_v6 }
 0x532   : > { %v2158_v27 = vadd.f32 %v4198_v39, %v2143_v45 }
 0x533   : > { %v2127_v38 = vpop.permute.xlu0 %2126  ;;  %v1354_v3 = vpop.permute.xlu1 %1353 }
 0x534   : > { %v2144_v17 = vadd.f32 %v2127_v38, %v2093_v11  ;;  %v2169_v40 = vmax.f32 %v2158_v27, 0.0  ;;  %v1379_v49 = vadd.f32 %v1354_v3, %v3411_v43 }
 0x536   : > { %v2159_v8 = vadd.f32 %v4198_v39, %v2144_v17 }
 0x537   : > { %v1356_v5 = vpop.permute.xlu0 %1355  ;;  %v1419_v14 = vpop.permute.xlu1 %1418 }
 0x538   : > { %v2170_v30 = vmax.f32 %v2159_v8, 0.0  ;;  %v1444_v51 = vadd.f32 %v1419_v14, %v1379_v49  ;;  %v1380_v54 = vadd.f32 %v1356_v5, %v3442_v59 }
 0x53a   : > { %v2179_v19 = vpack.c.bf16 %v2170_v30, %v2169_v40 }
 0x53b   : > { %v1421_v15 = vpop.permute.xlu0 %1420  ;;  %v1485_v61 = vpop.permute.xlu1 %1484 }
 0x53c   : > { %2779 = vmatmul.mubr.msk.bf16.gmra.mxu1 %vm777_vm3, %v2179_v19  ;;  %2785 = vmatmul.mubr.msk.bf16.gmra.mxu0 %vm777_vm3, %v2179_v19  ;;  %v1510_v46 = vadd.f32 %v1485_v61, %v1444_v51  ;;  %v1445_v13 = vadd.f32 %v1421_v15, %v1380_v54 }
 0x53d   : > { %2288 = vmatprep.mubr.bf16.mxu1 %v4586_v29  ;;  %2359 = vmatprep.mubr.bf16.mxu0 %v4586_v29 }
 0x53e   : > { %v1559_v23 = vadd.f32 %v3938_v50, %v1510_v46 }
 0x53f   : > { %v1487_v48 = vpop.permute.xlu0 %1486  ;;  %v1358_v53 = vpop.permute.xlu1 %1357 }
 0x540   : > { %v1381_v42 = vadd.f32 %v1358_v53, %v3471_v60  ;;  %v1511_v0 = vadd.f32 %v1487_v48, %v1445_v13 }
 0x542   : > { %v1560_v50 = vadd.f32 %v3956_v55, %v1511_v0  ;;  %v4590_v0 = vld [vmem:[#allocation3_spill] sm:$0xff] }
 0x543   : > { %v1597_v47 = vpop.permute.xlu0 %1596  ;;  %v1423_v16 = vpop.permute.xlu1 %1422 }
 0x544   : > { %v1446_v41 = vadd.f32 %v1423_v16, %v1381_v42  ;;  %v1619_v33 = vadd.f32 %v1597_v47, %v1559_v23 }
 0x547   : > { %v1657_v12 = vpop.permute.xlu0 %1656  ;;  %v1489_v62 = vpop.permute.xlu1 %1488 }
 0x548   : > { %v1512_v18 = vadd.f32 %v1489_v62, %v1446_v41  ;;  %v1679_v44 = vadd.f32 %v1657_v12, %v1619_v33  ;;  %v4587_v33 = vld [vmem:[#allocation34_spill] sm:$0xff] }
 0x54a   : > { %v1561_v43 = vadd.f32 %v3970_v63, %v1512_v18  ;;  %v1989_v18 = vsel %vm669_vm2, %v4587_v33, 0.0 }
 0x54b   : > { %v1718_v32 = vpop.permute.xlu0 %1717  ;;  %v1933_v31 = vpop.permute.xlu1 %1932 }
 0x54c   : > { %v1740_v34 = vadd.f32 %v1718_v32, %v1679_v44  ;;  %v4589_v44 = vld [vmem:[#allocation31_spill] sm:$0xff] }
 0x54e   : > { %v1786_v60 = vadd.f32 %v3945_v7, %v1740_v34 }
 0x54f   : > { %v1822_v58 = vpop.permute.xlu0 %1821  ;;  %v1599_v21 = vpop.permute.xlu1 %1598 }
 0x550   : > { %v1841_v35 = vadd.f32 %v1822_v58, %v1786_v60  ;;  %v1620_v1 = vadd.f32 %v1599_v21, %v1560_v50 }
 0x553   : > { %v1877_v20 = vpop.permute.xlu0 %1876  ;;  %v1659_v10 = vpop.permute.xlu1 %1658 }
 0x554   : > { %v1896_v56 = vadd.f32 %v1877_v20, %v1841_v35  ;;  %v1680_v26 = vadd.f32 %v1659_v10, %v1620_v1  ;;  %v4591_v1 = vld [vmem:[#allocation32_spill] sm:$0xff] }
 0x556   : > { %v1952_v59 = vadd.f32 %v1933_v31, %v1896_v56  ;;  %v1781_v56 = vsel %vm561_vm1, %v4591_v1, 0.0 }
 0x557   : > { %v1360_v4 = vpop.permute.xlu0 %1359  ;;  %v1720_v63 = vpop.permute.xlu1 %1719 }
 0x558   : > { %v1741_v57 = vadd.f32 %v1720_v63, %v1680_v26  ;;  %v1994_v25 = vadd.f32 %v3975_v2, %v1952_v59  ;;  %v1382_v53 = vadd.f32 %v1360_v4, %v3489_v28 }
 0x55a   : > { %v1787_v52 = vadd.f32 %v3963_v22, %v1741_v57 }
 0x55b   : > { %v1425_v24 = vpop.permute.xlu0 %1424  ;;  %v1824_v7 = vpop.permute.xlu1 %1823 }
 0x55c   : > { %v1842_v11 = vadd.f32 %v1824_v7, %v1787_v52  ;;  %v1447_v42 = vadd.f32 %v1425_v24, %v1382_v53 }
 0x55f   : > { %v1491_v6 = vpop.permute.xlu0 %1490  ;;  %v1879_v45 = vpop.permute.xlu1 %1878 }
 0x560   : > { %v1897_v38 = vadd.f32 %v1879_v45, %v1842_v11  ;;  %v1513_v16 = vadd.f32 %v1491_v6, %v1447_v42  ;;  %v4593_v6 = vld [vmem:[#allocation13_spill] sm:$0xff] }
 0x563   : > { %v1935_v55 = vpop.permute.xlu0 %1934  ;;  %v1601_v3 = vpop.permute.xlu1 %1600 }
 0x564   : > { %v1953_v27 = vadd.f32 %v1935_v55, %v1897_v38  ;;  %v1621_v17 = vadd.f32 %v1601_v3, %v1561_v43  ;;  %v1562_v43 = vadd.f32 %v4589_v44, %v1513_v16  ;;  %v4594_v55 = vld [vmem:[#allocation12_spill] sm:$0xff] }
 0x566   : > { %v1995_v8 = vadd.f32 %v3988_v36, %v1953_v27 }
 0x567   : > { %v1722_v5 = vpop.permute.xlu0 %1721  ;;  %v1661_v14 = vpop.permute.xlu1 %1660 }
 0x568   : > { %v1681_v40 = vadd.f32 %v1661_v14, %v1621_v17 }
 0x56a   : > { %v1742_v30 = vadd.f32 %v1722_v5, %v1681_v40 }
 0x56b   : > { %v2078_v19 = vpop.permute.xlu0 %2077  ;;  %v2028_v2 = vpop.permute.xlu1 %2027 }
 0x56c   : > { %v1788_v22 = vadd.f32 %v3980_v9, %v1742_v30  ;;  %v2044_v12 = vadd.f32 %v2028_v2, %v1994_v25  ;;  %v4588_v9 = vld [vmem:[#allocation2_spill] sm:$0xff] }
 0x56d   : > { %v1385_v54 = vadd.f32 %v4583_v37, %v4588_v9  ;;  %v4592_v37 = vld [vmem:[#allocation4_spill] sm:$0xff] }
 0x56e   : > { %v2094_v13 = vadd.f32 %v2078_v19, %v2044_v12  ;;  %v4595_v12 = vld [vmem:[#allocation33_spill] sm:$0xff] }
 0x56f   : > { %v1362_v15 = vpop.permute.xlu0 %1361  ;;  %v2129_v61 = vpop.permute.xlu1 %2128  ;;  %v1450_v60 = vadd.f32 %v1385_v54, %v4590_v0 }
 0x570   : > { %v2145_v50 = vadd.f32 %v2129_v61, %v2094_v13  ;;  %v1383_v3 = vadd.f32 %v1362_v15, %v4594_v55 }
 0x571   : > { %v1516_v59 = vadd.f32 %v1450_v60, %v4592_v37 }
 0x572   : > { %v2160_v25 = vadd.f32 %v4198_v39, %v2145_v50 }
 0x573   : > { %v1427_v49 = vpop.permute.xlu0 %1426  ;;  %v1493_v48 = vpop.permute.xlu1 %1492  ;;  %v1625_v24 = vadd.f32 %v1516_v59, %v4588_v9 }
 0x574   : > { %v2171_v27 = vmax.f32 %v2160_v25, 0.0  ;;  %v1448_v14 = vadd.f32 %v1427_v49, %v1383_v3 }
 0x575   : > { %v1685_v5 = vadd.f32 %v1625_v24, %v4590_v0 }
 0x576   : > { %v1514_v53 = vadd.f32 %v1493_v48, %v1448_v14 }
 0x577   : > { %v1826_v51 = vpop.permute.xlu0 %1825  ;;  %v1881_v46 = vpop.permute.xlu1 %1880  ;;  %v1746_v15 = vadd.f32 %v1685_v5, %v4592_v37 }
 0x578   : > { %v1843_v47 = vadd.f32 %v1826_v51, %v1788_v22 }
 0x57a   : > { %v1898_v36 = vadd.f32 %v1881_v46, %v1843_v47 }
 0x57b   : > { %v1937_v41 = vpop.permute.xlu0 %1936  ;;  %v1663_v23 = vpop.permute.xlu1 %1662 }
 0x57c   : > { %v1954_v62 = vadd.f32 %v1937_v41, %v1898_v36  ;;  %v1847_v36 = vadd.f32 %v1746_v15, %v4588_v9 }
 0x57e   : > { %v4255_v32 = vadd.f32 %v1989_v18, %v1954_v62  ;;  %v1563_v62 = vadd.f32 %v4595_v12, %v1514_v53 }
 0x57f   : > { %v1603_v28 = vpop.permute.xlu0 %1602  ;;  %v1724_v31 = vpop.permute.xlu1 %1723 }
 0x580   : > { %v1622_v34 = vadd.f32 %v1603_v28, %v1562_v43 }
 0x582   : > { %v1682_v58 = vadd.f32 %v1663_v23, %v1622_v34 }
 0x583   : > { %v2030_v21 = vpop.permute.xlu0 %2029  ;;  %v2080_v35 = vpop.permute.xlu1 %2079 }
 0x584   : > { %v1743_v20 = vadd.f32 %v1724_v31, %v1682_v58  ;;  %v2045_v10 = vadd.f32 %v2030_v21, %v1995_v8  ;;  %v1902_v31 = vadd.f32 %v1847_v36, %v4590_v0 }
 0x586   : > { %v2095_v26 = vadd.f32 %v2080_v35, %v2045_v10  ;;  %v1789_v4 = vadd.f32 %v1781_v56, %v1743_v20  ;;  %v1958_v10 = vadd.f32 %v1902_v31, %v4592_v37 }
 0x587   : > { %v2131_v63 = vpop.permute.xlu0 %2130  ;;  %v1364_v57 = vpop.permute.xlu1 %1363 }
 0x588   : > { %v2146_v52 = vadd.f32 %v2131_v63, %v2095_v26  ;;  %v1384_v45 = vadd.f32 %v1364_v57, %v4593_v6  ;;  %v2050_v25 = vadd.f32 %v1958_v10, %v4588_v9 }
 0x58a   : > { %v2161_v7 = vadd.f32 %v4198_v39, %v2146_v52 }
 0x58b   : > { %v1429_v11 = vpop.permute.xlu0 %1428  ;;  %v1495_v38 = vpop.permute.xlu1 %1494 }
 0x58c   : > { %v2172_v17 = vmax.f32 %v2161_v7, 0.0  ;;  %v1449_v8 = vadd.f32 %v1429_v11, %v1384_v45  ;;  %v2100_v11 = vadd.f32 %v2050_v25, %v4590_v0  ;;  %v278_v25 = vld [vmem:[%s4415_s4 + $0x4] sm:$0x1] }
 0x58e   : > { %v2180_v40 = vpack.c.bf16 %v2172_v17, %v2171_v27  ;;  %v1515_v30 = vadd.f32 %v1495_v38, %v1449_v8  ;;  %v2151_v3 = vadd.f32 %v2100_v11, %v4592_v37 }
 0x58f   : > { %v1828_v19 = vpop.permute.xlu0 %1827  ;;  %v1883_v2 = vpop.permute.xlu1 %1882 }
 0x590   : > { %v1624_v22 = vadd.f32 %v1515_v30, %v4588_v9  ;;  %v1844_v61 = vadd.f32 %v1828_v19, %v1789_v4  ;;  %2780 = vmatmul.mubr.msk.bf16.gmra.mxu1 %vm777_vm3, %v2180_v40  ;;  %2786 = vmatmul.mubr.msk.bf16.gmra.mxu0 %vm777_vm3, %v2180_v40  ;;  %v2946_v40 = vld [vmem:[%s4413_s2 + $0x30] sm:$0xff]  }
 0x591   : > { %2294 = vmatprep.mubr.bf16.mxu1 %v4586_v29  ;;  %2365 = vmatprep.mubr.bf16.mxu0 %v4586_v29 }
 0x592   : > { %v1684_v49 = vadd.f32 %v1624_v22, %v4590_v0  ;;  %v1899_v51 = vadd.f32 %v1883_v2, %v1844_v61 }
 0x593   : > { %v1939_v46 = vpop.permute.xlu0 %1938  ;;  %v1665_v42 = vpop.permute.xlu1 %1664 }
 0x594   : > { %v1745_v47 = vadd.f32 %v1684_v49, %v4592_v37  ;;  %v1955_v16 = vadd.f32 %v1939_v46, %v1899_v51 }
 0x596   : > { %v1846_v41 = vadd.f32 %v1745_v47, %v4588_v9  ;;  %v2047_v23 = vadd.f32 %v1955_v16, %v4588_v9 }
 0x597   : > { %v1605_v33 = vpop.permute.xlu0 %1604  ;;  %v1726_v18 = vpop.permute.xlu1 %1725 }
 0x598   : > { %v1901_v48 = vadd.f32 %v1846_v41, %v4590_v0  ;;  %v2097_v54 = vadd.f32 %v2047_v23, %v4590_v0  ;;  %v1623_v44 = vadd.f32 %v1605_v33, %v1563_v62  ;;  %v2948_v41 = vld [vmem:[%s4413_s2 + $0x20] sm:$0xff]   ;;  %v2460_v23 = vlaneseq }
 0x59a   : > { %v1957_v43 = vadd.f32 %v1901_v48, %v4592_v37  ;;  %v1683_v28 = vadd.f32 %v1665_v42, %v1623_v44  ;;  %v2148_v58 = vadd.f32 %v2097_v54, %v4592_v37  ;;  %v2947_v42 = vld [vmem:[%s4413_s2 + $0x28] sm:$0xff]   ;;  %v4348_v44 = vshrl.u32 %v2460_v23, 7 }
 0x59b   : > { %v2032_v13 = vpop.permute.xlu0 %2031  ;;  %v2082_v34 = vpop.permute.xlu1 %2081  ;;  %vm2646_vm10 = vcmp.lt.s32.totalorder %v2460_v23, 256 }
 0x59c   : > { %v2049_v60 = vadd.f32 %v1957_v43, %v4588_v9  ;;  %v1744_v21 = vadd.f32 %v1726_v18, %v1683_v28  ;;  %v2046_v35 = vadd.f32 %v2032_v13, %v4255_v32  ;;  %v2163_v59 = vadd.f32 %v4198_v39, %v2148_v58 }
 0x59d   : > { %v2462_v58 = vsub.s32 0, %v4348_v44 }
 0x59e   : > { %v1845_v50 = vadd.f32 %v1744_v21, %v4588_v9  ;;  %v2096_v20 = vadd.f32 %v2082_v34, %v2046_v35  ;;  %v2099_v4 = vadd.f32 %v2049_v60, %v4590_v0  ;;  %v2174_v52 = vmax.f32 %v2163_v59, 0.0  ;;  %v4361_v21 = vld [vmem:[%s232_s22] sm:$0x1] }
 0x59f   : > { %v2133_v1 = vpop.permute.xlu1 %2132 }
 0x5a0   : > { %v1900_v56 = vadd.f32 %v1845_v50, %v4590_v0  ;;  %v2147_v26 = vadd.f32 %v2133_v1, %v2096_v20  ;;  %v2150_v7 = vadd.f32 %v2099_v4, %v4592_v37  ;;  %v2463_v20 = vrot.slane %v4361_v21, %v2462_v58 }
 0x5a2   : > { %v1956_v63 = vadd.f32 %v1900_v56, %v4592_v37  ;;  %v2162_v57 = vadd.f32 %v4198_v39, %v2147_v26  ;;  %v2165_v55 = vadd.f32 %v4198_v39, %v2150_v7 }
 0x5a4   : > { %v2048_v32 = vadd.f32 %v1956_v63, %v4588_v9  ;;  %v2173_v24 = vmax.f32 %v2162_v57, 0.0  ;;  %v2176_v17 = vmax.f32 %v2165_v55, 0.0 }
 0x5a6   : > { %v2098_v6 = vadd.f32 %v2048_v32, %v4590_v0  ;;  %v2181_v45 = vpack.c.bf16 %v2174_v52, %v2173_v24  ;;  %v2166_v0 = vadd.f32 %v4198_v39, %v2151_v3 }
 0x5a8   : > { %2781 = vmatmul.mubr.msk.bf16.gmra.mxu1 %vm777_vm3, %v2181_v45  ;;  %2787 = vmatmul.mubr.msk.bf16.gmra.mxu0 %vm777_vm3, %v2181_v45  ;;  %v2149_v38 = vadd.f32 %v2098_v6, %v4592_v37  ;;  %v2177_v5 = vmax.f32 %v2166_v0, 0.0  ;;  %v2945_v37 = vld [vmem:[%s4413_s2 + $0x38] sm:$0xff]  }
 0x5a9   : > { %2300 = vmatprep.mubr.bf16.mxu1 %v4586_v29  ;;  %2371 = vmatprep.mubr.bf16.mxu0 %v4586_v29 }
 0x5aa   : > { %v2164_v9 = vadd.f32 %v4198_v39, %v2149_v38  ;;  %v2183_v14 = vpack.c.bf16 %v2177_v5, %v2177_v5  ;;  %2876 = vmatpush3.bf16.msra.mxu1 %v2945_v37  ;;  %v4596_v39 = vmov 0.0  }
 0x5ab   : > { %2877 = vmatprep.subr.bf16.mxu1 %v4596_v39 }
 0x5ac   : > { %v2175_v27 = vmax.f32 %v2164_v9, 0.0 }
 0x5ae   : > { %v2182_v8 = vpack.c.bf16 %v2176_v17, %v2175_v27  ;;  %2878 = vmatpush3.bf16.msra.mxu1 %v2946_v40 }
 0x5af   : > { %2879 = vmatprep.subr.bf16.mxu1 %v4596_v39 }
 0x5b0   : > { %2782 = vmatmul.mubr.msk.bf16.gmra.mxu1 %vm777_vm3, %v2182_v8  ;;  %2788 = vmatmul.mubr.msk.bf16.gmra.mxu0 %vm777_vm3, %v2182_v8 }
 0x5b1   : > { %2306 = vmatprep.mubr.bf16.mxu1 %v4586_v29  ;;  %2377 = vmatprep.mubr.bf16.mxu0 %v4586_v29 }
 0x5b2   : > { %2880 = vmatpush3.bf16.msra.mxu1 %v2947_v42 }
 0x5b3   : > { %2881 = vmatprep.subr.bf16.mxu1 %v4596_v39 }
 0x5b6   : > { %2882 = vmatpush3.bf16.msra.mxu1 %v2948_v41 }
 0x5b7   : > { %2887 = vmatprep.subr.bf16.mxu1 %v4596_v39 }
 0x5b8   : > { %2783 = vmatmul.mubr.msk.bf16.gmra.mxu1 %vm777_vm3, %v2183_v14  ;;  %2789 = vmatmul.mubr.msk.bf16.gmra.mxu0 %vm777_vm3, %v2183_v14 }
 0x5b9   : > { %2883 = vmatprep.mubr.msk.bf16.mxu1 %vm2972_vm8, %v4596_v39 }
 0x5de   : > { %v4321_v29 = vpop.f32.mrf.mxu1  ;;  %v2347_v30 = vpop.f32.mrf.mxu0 }
 0x5df   : > { %v2386_v19 = vrot.slane %v4321_v29, 1  ;;  %v2396_v2 = vrot.slane %v4321_v29, 3  ;;  %v2391_v49 = vrot.slane %v4321_v29, 2  ;;  %v2384_v52 = vadd.f32 %v4321_v29, %v278_v25 }
 0x5e0   : > { %v2278_v22 = vpop.f32.mrf.mxu1  ;;  %v2348_v61 = vpop.f32.mrf.mxu0 }
 0x5e1   : > { %2397 = vrot.lane.b32.xlu1 %v2396_v2, %s2969_s9  ;;  %2387 = vrot.lane.b32.xlu0 %v2386_v19, %s2967_s30 }
 0x5e2   : > { %v2279_v15 = vpop.f32.mrf.mxu1  ;;  %v2349_v53 = vpop.f32.mrf.mxu0 }
 0x5e4   : > { %v4328_v51 = vpop.f32.mrf.mxu1  ;;  %v2350_v46 = vpop.f32.mrf.mxu0 }
 0x5e5   : > { %v2410_v47 = vrot.slane %v4328_v51, 3  ;;  %2392 = vrot.lane.b32.xlu0 %v2391_v49, %s2968_s6  ;;  %v2405_v16 = vrot.slane %v4328_v51, 2  ;;  %v2415_v36 = vrot.slane %v4328_v51, 4  ;;  %v2402_v38 = vrot.slane %v4328_v51, 1 }
 0x5e7   : > { %2411 = vrot.lane.b32.xlu1 %v2410_v47, %s2968_s6 }
 0x5e9   : > { %2406 = vrot.lane.b32.xlu0 %v2405_v16, %s2967_s30 }
 0x5ed   : > { %2416 = vrot.lane.b32.xlu0 %v2415_v36, %s2969_s9 }
 0x5fc   : > { %v2284_v12 = vpop.f32.mrf.mxu1  ;;  %v2353_v62 = vpop.f32.mrf.mxu0 }
 0x5fd   : > { %v2424_v33 = vrot.slane %v2353_v62, 3  ;;  %v2429_v18 = vrot.slane %v2353_v62, 4  ;;  %v2434_v31 = vrot.slane %v2353_v62, 5  ;;  %v2421_v37 = vrot.slane %v2353_v62, 2 }
 0x5fe   : > { %v2285_v48 = vpop.f32.mrf.mxu1  ;;  %v2355_v54 = vpop.f32.mrf.mxu0 }
 0x5ff   : > { %2430 = vrot.lane.b32.xlu0 %v2429_v18, %s2968_s6  ;;  %2425 = vrot.lane.b32.xlu1 %v2424_v33, %s2967_s30 }
 0x600   : > { %v2286_v43 = vpop.f32.mrf.mxu1  ;;  %v2356_v28 = vpop.f32.mrf.mxu0 }
 0x602   : > { %v2287_v13 = vpop.f32.mrf.mxu1  ;;  %v4354_v34 = vpop.f32.mrf.mxu0 }
 0x603   : > { %v2443_v60 = vrot.slane %v4354_v34, 4  ;;  %2435 = vrot.lane.b32.xlu1 %v2434_v31, %s2969_s9  ;;  %v2448_v35 = vrot.slane %v4354_v34, 5  ;;  %v2453_v50 = vrot.slane %v4354_v34, 6  ;;  %v2440_v48 = vrot.slane %v4354_v34, 3 }
 0x605   : > { %2444 = vrot.lane.b32.xlu0 %v2443_v60, %s2967_s30 }
 0x607   : > { %2449 = vrot.lane.b32.xlu1 %v2448_v35, %s2968_s6 }
 0x609   : > { %2454 = vrot.lane.b32.xlu0 %v2453_v50, %s2969_s9 }
 0x60b   : > { %2464 = vrot.lane.b32.xlu1 %v2463_v20, %s2969_s9 }
 0x650   : > { %v2290_v10 = vpop.f32.mrf.mxu1  ;;  %v2361_v1 = vpop.f32.mrf.mxu0 }
 0x652   : > { %v2291_v56 = vpop.f32.mrf.mxu1  ;;  %v2362_v59 = vpop.f32.mrf.mxu0 }
 0x653   : > { %v2388_v32 = vpop.permute.xlu0 %2387  ;;  %v2398_v45 = vpop.permute.xlu1 %2397 }
 0x654   : > { %v2292_v26 = vpop.f32.mrf.mxu1  ;;  %v2363_v4 = vpop.f32.mrf.mxu0  ;;  %v2390_v24 = vadd.f32 %v2388_v32, %v2384_v52 }
 0x656   : > { %v2293_v63 = vpop.f32.mrf.mxu1  ;;  %v2364_v57 = vpop.f32.mrf.mxu0 }
 0x657   : > { %v2393_v7 = vpop.permute.xlu0 %2392  ;;  %v279_v57 = vld [vmem:[%s4415_s4 + $0x5] sm:$0x1] }
 0x658   : > { %v2395_v6 = vadd.f32 %v2393_v7, %v2390_v24 }
 0x659   : > { %v2412_v27 = vpop.permute.xlu1 %2411 }
 0x65a   : > { %v2400_v11 = vadd.f32 %v2398_v45, %v2395_v6 }
 0x65b   : > { %v2407_v55 = vpop.permute.xlu0 %2406 }
 0x65c   : > { %v2404_v9 = vadd.f32 %v2402_v38, %v2400_v11 }
 0x65e   : > { %v2409_v3 = vadd.f32 %v2407_v55, %v2404_v9 }
 0x65f   : > { %v2417_v8 = vpop.permute.xlu0 %2416 }
 0x660   : > { %v2414_v17 = vadd.f32 %v2412_v27, %v2409_v3 }
 0x662   : > { %v2419_v0 = vadd.f32 %v2417_v8, %v2414_v17 }
 0x664   : > { %v2423_v29 = vadd.f32 %v2421_v37, %v2419_v0  ;;  %v2949_v0 = vld [vmem:[%s4413_s2 + $0x48] sm:$0xff]  }
 0x668   : > { %v2296_v5 = vpop.f32.mrf.mxu1  ;;  %v2367_v14 = vpop.f32.mrf.mxu0 }
 0x669   : > { %v2950_v5 = vld [vmem:[%s4413_s2 + $0x40] sm:$0xff]  }
 0x66a   : > { %v2297_v40 = vpop.f32.mrf.mxu1  ;;  %v2368_v30 = vpop.f32.mrf.mxu0 }
 0x66c   : > { %v2298_v19 = vpop.f32.mrf.mxu1  ;;  %v2369_v2 = vpop.f32.mrf.mxu0 }
 0x66e   : > { %v2299_v22 = vpop.f32.mrf.mxu1  ;;  %v2370_v61 = vpop.f32.mrf.mxu0 }
 0x670   : > { %v2302_v15 = vpop.f32.mrf.mxu1  ;;  %v2373_v53 = vpop.f32.mrf.mxu0 }
 0x671   : > { %v2426_v49 = vpop.permute.xlu1 %2425  ;;  %v2431_v47 = vpop.permute.xlu0 %2430 }
 0x672   : > { %v2428_v51 = vadd.f32 %v2426_v49, %v2423_v29  ;;  %v2303_v46 = vpop.f32.mrf.mxu1  ;;  %v2374_v42 = vpop.f32.mrf.mxu0  ;;  %v2973_v29 = vmov 1966171168  }
 0x673   : > { %v2630_v19 = vunpack.c.l.s4 %v2973_v29 }
 0x674   : > { %v2304_v16 = vpop.f32.mrf.mxu1  ;;  %v2375_v36 = vpop.f32.mrf.mxu0  ;;  %v2433_v41 = vadd.f32 %v2431_v47, %v2428_v51 }
 0x675   : > { %v2436_v12 = vpop.permute.xlu1 %2435  ;;  %v2631_v22 = vunpack.c.0.s8 %v2630_v19 }
 0x676   : > { %v2438_v33 = vadd.f32 %v2436_v12, %v2433_v41  ;;  %v2305_v62 = vpop.f32.mrf.mxu1  ;;  %v2376_v18 = vpop.f32.mrf.mxu0 }
 0x677   : > { %v2445_v54 = vpop.permute.xlu0 %2444  ;;  %v2634_v49 = vsub.s32 %v2631_v22, %v4348_v44 }
 0x678   : > { %v2442_v43 = vadd.f32 %v2440_v48, %v2438_v33  ;;  %v2308_v28 = vpop.f32.mrf.mxu1  ;;  %v2379_v31 = vpop.f32.mrf.mxu0 }
 0x679   : > { %v2450_v13 = vpop.permute.xlu1 %2449 }
 0x67a   : > { %v2447_v60 = vadd.f32 %v2445_v54, %v2442_v43  ;;  %v2309_v58 = vpop.f32.mrf.mxu1  ;;  %v2380_v35 = vpop.f32.mrf.mxu0 }
 0x67b   : > { %v2455_v1 = vpop.permute.xlu0 %2454 }
 0x67c   : > { %v2452_v50 = vadd.f32 %v2450_v13, %v2447_v60  ;;  %v2310_v20 = vpop.f32.mrf.mxu1  ;;  %v2381_v10 = vpop.f32.mrf.mxu0 }
 0x67d   : > { %v2465_v56 = vpop.permute.xlu1 %2464 }
 0x67e   : > { %v2457_v59 = vadd.f32 %v2455_v1, %v2452_v50  ;;  %v2311_v26 = vpop.f32.mrf.mxu1  ;;  %v2382_v4 = vpop.f32.mrf.mxu0 }
 0x680   : > { %v2467_v63 = vsel %vm777_vm3, %v2457_v59, %v2465_v56 }
 0x681   : > { %v2468_v34 = vpack.c.bf16 %v2467_v63, %v2467_v63 }
 0x683   : > { %2884 = vmatmul.mubr.msk.bf16.vlgmr.msra.gmra.mxu1 %vm2493_vm9, %v2468_v34 }
 0x684   : > { %2891 = vmatprep.mubr.msk.bf16.mxu1 %vm2972_vm8, %v4596_v39  ;;  %2888 = vmatpush3.bf16.msra.mxu1 %v2949_v0 }
 0x685   : > { %2889 = vmatprep.subr.bf16.mxu1 %v4596_v39  ;;  %v280_v39 = vld [vmem:[%s4415_s4 + $0x6] sm:$0x1] }
 0x688   : > { %2890 = vmatpush3.bf16.msra.mxu1 %v2950_v5 }
 0x743   : > { %v2531_v25 = vpop.f32.mrf.mxu1 }
 0x744   : > { %v2532_v32 = vadd.f32 %v2531_v25, %v279_v57 }
 0x745   : > { %v2885_v52 = vpop.f32.mrf.mxu1 }
 0x746   : > { %2951 = vtanh.f32 %v2532_v32  ;;  %v2795_v45 = vmul.f32 -1.442695, %v2532_v32 }
 0x747   : > { %v2534_v24 = vpop.f32.mrf.mxu1 }
 0x748   : > { %2953 = vpow2.f32 %v2795_v45 }
 0x749   : > { %v2886_v7 = vpop.f32.mrf.mxu1 }
 0x753   : > { %v2952_v6 = vpop.eup %2951 }
 0x754   : > { %2546 = vrot.lane.b32.xlu0 %v2952_v6, %s2968_s6 }
 0x755   : > { %v2954_v11 = vpop.eup %2953 }
 0x756   : > { %v2540_v38 = vadd.f32 1.0, %v2954_v11 }
 0x758   : > { %2955 = vrcp.f32 %v2540_v38 }
 0x765   : > { %v2956_v55 = vpop.eup %2955 }
 0x766   : > { %v2544_v27 = vmul.f32 %v2956_v55, %v4361_v21 }
 0x7c6   : > { %v2547_v9 = vpop.permute.xlu0 %2546 }
 0x7c7   : > { %v2549_v3 = vmul.f32 %v2956_v55, %v2547_v9 }
 0x7c9   : > { %2551 = vrot.lane.b32.xlu1 %v2549_v3, %s2969_s9 }
 0x83b   : > { %v2552_v17 = vpop.permute.xlu1 %2551 }
 0x83c   : > { %v2554_v8 = vadd.f32 %v2552_v17, %v2544_v27 }
 0x83e   : > { %2957 = vtanh.f32 %v2554_v8 }
 0x84b   : > { %v2958_v14 = vpop.eup %2957 }
 0x84c   : > { %2557 = vrot.lane.b32.xlu0 %v2958_v14, %s2968_s6  ;;  %s2717_s6 = sshll.u32 %s4598_s19, 1 }
 0x84d   : > { %s236_s11 = scalar_lea.vmem %s4416_s5, %s2717_s6 }
 0x8be   : > { %v2558_v37 = vpop.permute.xlu0 %2557 }
 0x8bf   : > { %v2560_v21 = vmul.f32 %v2956_v55, %v2558_v37 }
 0x8c1   : > { %v2561_v40 = vpack.c.bf16 %v2560_v21, %v2560_v21  ;;  %2621 = vrot.lane.b32.xlu0 %v2560_v21, %s2969_s9 }
 0x8c3   : > { %2563 = vrot.lane.b32.xlu1 %v2561_v40, %s2969_s9 }
 0x933   : > { %v2622_v2 = vpop.permute.xlu0 %2621 }
 0x934   : > { %v2624_v61 = vsel %vm777_vm3, %v2622_v2, %v2554_v8 }
 0x935   : > { %v2564_v30 = vpop.permute.xlu1 %2563  ;;  %v2625_v51 = vsel %vm2493_vm9, %v2624_v61, 0.0 }
 0x936   : > { %2892 = vmatmul.mubr.msk.bf16.vlgmr.msra.gmra.mxu1 %vm777_vm3, %v2564_v30 }
 0x9f6   : > { %v2614_v15 = vpop.f32.mrf.mxu1 }
 0x9f7   : > { %v2615_v53 = vadd.f32 %v2614_v15, %v280_v39 }
 0x9f8   : > { %v2893_v46 = vpop.f32.mrf.mxu1 }
 0x9f9   : > { %v2628_v42 = vcombine.low %v2615_v53, %v2625_v51 }
 0x9fa   : > { %v2617_v47 = vpop.f32.mrf.mxu1 }
 0x9fb   : > { %v2635_v16 = vrot.slane %v2628_v42, %v2634_v49 }
 0x9fc   : > { %v2894_v36 = vpop.f32.mrf.mxu1 }
 0x9fd   : > { %v2642_v41 = vrot.slane %v2635_v16, %v2634_v49 }
 0x9ff   : > { %2648 = vst.msk [vmem:[%s236_s11] sm:$0x3] %vm2646_vm10, %v2642_v41 }
 0xa00 PF: > { %s15_s18 = sadd.s32 1, %s2965_s18  }
 0xa01   : > { %p12_p4 = scmp.ge.s32.totalorder %s15_s18, 4  }
 0xa03   :  { %14 = sbr.rel (!%p12_p4) target bundleno = 1 (0x1), region = 73 }

</bundles_post_ra>
